<compile_context>
chip_gen: v6e
topology: v6e:2x2x1
jax: 0.10.0
libtpu: 0.0.40
codegen_flags: <defaults>
</compile_context>

<pallas_src>
import numpy as np
import jax
import jax.numpy as jnp
from jax import lax
from jax.experimental import pallas as pl
from jax.experimental.pallas import tpu as pltpu


def get_frequency_modes(seq_len, modes=64, mode_select_method='random'):
    """Same semantics as the PyTorch helper, but with a fixed RNG for determinism."""
    modes = min(modes, seq_len // 2)
    if mode_select_method == 'random':
        index = list(range(0, seq_len // 2))
        rng = np.random.RandomState(0)   # deterministic in-script
        rng.shuffle(index)
        index = index[:modes]
    else:
        index = list(range(0, modes))
    index.sort()
    return index


# ----------------------------- Pallas kernel ------------------------------ #
def _compl_mul_kernel(x_ref, w_ref, o_ref):
    # x_ref: (2, T, Bp, E)  bf16   [real, imag] activations for T (head,mode) pairs
    # w_ref: (2, T, E, Eo)  bf16   [wr, wi] weights for the same pairs
    # o_ref: (2, T, Bp, Eo) f32    [real, imag] outputs
    xr = x_ref[0]            # (T, Bp, E)
    xi = x_ref[1]
    wr = w_ref[0]            # (T, E, Eo)
    wi = w_ref[1]
    dn = (((2,), (1,)), ((0,), (0,)))   # contract E, batch over the pair axis
    rr = lax.dot_general(xr, wr, dn, preferred_element_type=jnp.float32)
    ii = lax.dot_general(xi, wi, dn, preferred_element_type=jnp.float32)
    ri = lax.dot_general(xr, wi, dn, preferred_element_type=jnp.float32)
    ir = lax.dot_general(xi, wr, dn, preferred_element_type=jnp.float32)
    o_ref[0] = rr - ii       # real part
    o_ref[1] = ri + ir       # imag part


def _pick_tiling(HM, Bp, E, Eo, target_pairs=128, vmem_budget=40 * 1024 * 1024):
    """Pick pairs-per-step T (a divisor of HM -> no padding) and a VMEM limit."""
    # Bytes of one (head, mode) pair's block: bf16 x + bf16 w + f32 out (x2 for real/imag).
    per_pair = 2 * (Bp * E * 2 + E * Eo * 2 + Bp * Eo * 4)
    t_cap = max(1, min(target_pairs, vmem_budget // (2 * per_pair), HM))
    # Keep the grid length >= 2 when possible so v7x's two TensorCores both get work.
    if HM >= 2:
        t_cap = min(t_cap, max(1, HM // 2))
    T = 1
    for t in range(int(t_cap), 0, -1):
        if HM % t == 0:
            T = t
            break
    # Generous but capped scoped-VMEM limit (v7x has only 64 MiB physical per TC).
    vmem_limit = int(min(48 * 1024 * 1024,
                         max(16 * 1024 * 1024, 4 * T * per_pair + 4 * 1024 * 1024)))
    return T, vmem_limit


def compl_mul1d_pallas(x2, w2):
    """Batched complex matmul over (head, mode) pairs.

    x2: (2, HM, Bp, E)  bf16  — [real, imag] activations per pair (batch padded to 8)
    w2: (2, HM, E, Eo)  bf16  — [wr, wi] weights per pair
    returns (2, HM, Bp, Eo) float32 — [real, imag] outputs.
    """
    _, HM, Bp, E = x2.shape
    Eo = w2.shape[-1]
    T, vmem_limit = _pick_tiling(HM, Bp, E, Eo)

    out = pl.pallas_call(
        _compl_mul_kernel,
        out_shape=jax.ShapeDtypeStruct((2, HM, Bp, Eo), jnp.float32),
        grid_spec=pltpu.PrefetchScalarGridSpec(
            num_scalar_prefetch=0,
            grid=(HM // T,),
            in_specs=[pl.BlockSpec((2, T, Bp, E), lambda i: (0, i, 0, 0)),
                      pl.BlockSpec((2, T, E, Eo), lambda i: (0, i, 0, 0))],
            out_specs=pl.BlockSpec((2, T, Bp, Eo), lambda i: (0, i, 0, 0))),
        compiler_params=pltpu.CompilerParams(
            # "parallel" is safe on all generations; on v7x CORE_PARALLEL could be used.
            dimension_semantics=("parallel",),
            vmem_limit_bytes=vmem_limit),
    )(x2, w2)
    return out


# ------------------------------ FourierBlock ------------------------------ #
class FourierBlock:
    def __init__(self, in_channels, out_channels, seq_len, modes=0,
                 mode_select_method='random', key=None):
        self.index = get_frequency_modes(seq_len, modes=modes,
                                         mode_select_method=mode_select_method)
        self.in_channels = in_channels
        self.out_channels = out_channels
        self.scale = 1.0 / (in_channels * out_channels)
        M = len(self.index)
        H = 8
        E = in_channels // 8
        Eo = out_channels // 8
        if key is None:
            key = jax.random.PRNGKey(42)
        kr, ki = jax.random.split(key)
        shape = (H, E, Eo, M)
        # torch.rand(..., dtype=torch.cfloat): real & imag each ~ U[0,1).  Keep f32 masters
        # (used by the pure-JAX reference); the kernel consumes a bf16 copy.
        self.w_real = self.scale * jax.random.uniform(kr, shape, jnp.float32)
        self.w_imag = self.scale * jax.random.uniform(ki, shape, jnp.float32)

        # Kernel-ready weight, built once (hoisted out of __call__):
        #   (2, H*M, E, Eo) bf16 with [wr, wi] on the leading axis — minimal weight bytes.
        wr = jnp.transpose(self.w_real, (0, 3, 1, 2)).reshape(H * M, E, Eo)
        wi = jnp.transpose(self.w_imag, (0, 3, 1, 2)).reshape(H * M, E, Eo)
        self.w_kernel = jnp.stack([wr, wi], axis=0).astype(jnp.bfloat16)

    def __call__(self, q, k, v, mask):
        B, L, H, E = q.shape
        assert H == 8, "weights1 leading dim is 8 (einsum 'bhi,hio' requires H==8)"
        M = len(self.index)
        Eo = self.out_channels // 8

        x = jnp.transpose(q, (0, 2, 3, 1))                       # (B,H,E,L)
        x_ft = jnp.fft.rfft(x, axis=-1)                          # (B,H,E,L//2+1) c64
        idx = jnp.asarray(self.index, dtype=jnp.int32)
        xm = jnp.take(x_ft, idx, axis=-1)                        # (B,H,E,M)
        xm = jnp.transpose(xm, (1, 3, 0, 2)).reshape(H * M, B, E)   # (HM,B,E) c64

        # Stack real/imag on a leading axis; pad batch to a multiple of 8 (sublane density).
        x2 = jnp.stack([jnp.real(xm), jnp.imag(xm)], axis=0)     # (2,HM,B,E) f32
        Bp = ((B + 7) // 8) * 8
        if Bp != B:
            x2 = jnp.pad(x2, ((0, 0), (0, 0), (0, Bp - B), (0, 0)))
        x2 = x2.astype(jnp.bfloat16)

        o = compl_mul1d_pallas(x2, self.w_kernel)                # (2,HM,Bp,Eo) f32
        o = o[:, :, :B, :].reshape(2, H, M, B, Eo)
        o_r = jnp.transpose(o[0], (2, 0, 3, 1))                  # (B,H,Eo,M)
        o_i = jnp.transpose(o[1], (2, 0, 3, 1))                  # (B,H,Eo,M)

        # Matches the PyTorch code: result of mode `index[wi]` is written into frequency
        # bin `wi` (NOT bin index[wi]); all other bins stay zero.
        out_ft = jnp.zeros((B, H, Eo, L // 2 + 1), dtype=jnp.complex64)
        out_ft = out_ft.at[..., :M].set(o_r + 1j * o_i)
        x_out = jnp.fft.irfft(out_ft, n=L, axis=-1)              # (B,H,Eo,L) f32
        return x_out, None


# --------------------------- pure-JAX reference ---------------------------- #
def reference_forward(block, q):
    B, L, H, E = q.shape
    x = jnp.transpose(q, (0, 2, 3, 1))
    x_ft = jnp.fft.rfft(x, axis=-1)
    w = block.w_real + 1j * block.w_imag
    out_ft = jnp.zeros((B, H, block.out_channels // 8, L // 2 + 1),
                       dtype=jnp.complex64)
    for wi, i in enumerate(block.index):
        val = jnp.einsum('bhi,hio->bho', x_ft[:, :, :, i], w[:, :, :, wi])
        out_ft = out_ft.at[:, :, :, wi].set(val)
    return jnp.fft.irfft(out_ft, n=L, axis=-1)


if __name__ == "__main__":
    # Small shapes consistent with the module: B=2, L=16, H=8 heads, E=8
    # per-head channels  =>  in_channels = out_channels = 64, modes=4.
    B, L, H, E = 2, 16, 8, 8
    in_channels = out_channels = H * E
    modes = 4

    key = jax.random.PRNGKey(0)
    kq, kk, kv, kw = jax.random.split(key, 4)
    q = jax.random.normal(kq, (B, L, H, E), dtype=jnp.float32)
    k = jax.random.normal(kk, (B, L, H, E), dtype=jnp.float32)
    v = jax.random.normal(kv, (B, L, H, E), dtype=jnp.float32)

    block = FourierBlock(in_channels, out_channels, seq_len=L, modes=modes,
                         mode_select_method='random', key=kw)

    out, _ = block(q, k, v, mask=None)
    out = jax.block_until_ready(out)

    ref = jax.block_until_ready(reference_forward(block, q))
    assert out.shape == (B, H, out_channels // 8, L)
    assert out.dtype == jnp.float32
    # bf16 weights/activations (f32 accumulation) -> loosened tolerance vs the f32 reference.
    np.testing.assert_allclose(np.asarray(out), np.asarray(ref),
                               rtol=3e-2, atol=2e-4)
    print("KERNEL_OK")
</pallas_src>

<mosaic_0001>
module attributes {stable_mosaic.version = 11 : i64} {
  func.func @_compl_mul_kernel(%arg0: i32, %arg1: memref<2x16x8x8xbf16, #tpu.memory_space<vmem>>, %arg2: memref<2x16x8x8xbf16, #tpu.memory_space<vmem>>, %arg3: memref<2x16x8x8xf32, #tpu.memory_space<vmem>>) attributes {dimension_semantics = [#tpu.dimension_semantics<parallel>], iteration_bounds = array<i64: 2>, scalar_prefetch = 0 : i64, scratch_operands = 0 : i64, tpu.core_type = #tpu.core_type<tc>, window_params = [{transform_indices = @transform_0, window_bounds = array<i64: 2, 16, 8, 8>}, {transform_indices = @transform_1, window_bounds = array<i64: 2, 16, 8, 8>}, {transform_indices = @transform_2, window_bounds = array<i64: 2, 16, 8, 8>}]} {
    %c0 = arith.constant 0 : index
    %c0_0 = arith.constant 0 : index
    %c0_1 = arith.constant 0 : index
    %c0_2 = arith.constant 0 : index
    %0 = vector.load %arg1[%c0, %c0_0, %c0_1, %c0_2] : memref<2x16x8x8xbf16, #tpu.memory_space<vmem>>, vector<1x16x8x8xbf16>
    %1 = vector.shape_cast %0 : vector<1x16x8x8xbf16> to vector<16x8x8xbf16>
    %c1 = arith.constant 1 : index
    %c0_3 = arith.constant 0 : index
    %c0_4 = arith.constant 0 : index
    %c0_5 = arith.constant 0 : index
    %2 = vector.load %arg1[%c1, %c0_3, %c0_4, %c0_5] : memref<2x16x8x8xbf16, #tpu.memory_space<vmem>>, vector<1x16x8x8xbf16>
    %3 = vector.shape_cast %2 : vector<1x16x8x8xbf16> to vector<16x8x8xbf16>
    %c0_6 = arith.constant 0 : index
    %c0_7 = arith.constant 0 : index
    %c0_8 = arith.constant 0 : index
    %c0_9 = arith.constant 0 : index
    %4 = vector.load %arg2[%c0_6, %c0_7, %c0_8, %c0_9] : memref<2x16x8x8xbf16, #tpu.memory_space<vmem>>, vector<1x16x8x8xbf16>
    %5 = vector.shape_cast %4 : vector<1x16x8x8xbf16> to vector<16x8x8xbf16>
    %c1_10 = arith.constant 1 : index
    %c0_11 = arith.constant 0 : index
    %c0_12 = arith.constant 0 : index
    %c0_13 = arith.constant 0 : index
    %6 = vector.load %arg2[%c1_10, %c0_11, %c0_12, %c0_13] : memref<2x16x8x8xbf16, #tpu.memory_space<vmem>>, vector<1x16x8x8xbf16>
    %7 = vector.shape_cast %6 : vector<1x16x8x8xbf16> to vector<16x8x8xbf16>
    %cst = arith.constant dense<0.000000e+00> : vector<16x8x8xf32>
    %8 = tpu.matmul %1, %5, %cst {dimension_numbers = #tpu.dot_dimension_numbers<[2], [1], [1], [2], [0, 0, 0, 1, 1, 2], [0], [0]>} : vector<16x8x8xbf16>, vector<16x8x8xbf16>, vector<16x8x8xf32> -> vector<16x8x8xf32>
    %cst_14 = arith.constant dense<0.000000e+00> : vector<16x8x8xf32>
    %9 = tpu.matmul %3, %7, %cst_14 {dimension_numbers = #tpu.dot_dimension_numbers<[2], [1], [1], [2], [0, 0, 0, 1, 1, 2], [0], [0]>} : vector<16x8x8xbf16>, vector<16x8x8xbf16>, vector<16x8x8xf32> -> vector<16x8x8xf32>
    %cst_15 = arith.constant dense<0.000000e+00> : vector<16x8x8xf32>
    %10 = tpu.matmul %1, %7, %cst_15 {dimension_numbers = #tpu.dot_dimension_numbers<[2], [1], [1], [2], [0, 0, 0, 1, 1, 2], [0], [0]>} : vector<16x8x8xbf16>, vector<16x8x8xbf16>, vector<16x8x8xf32> -> vector<16x8x8xf32>
    %cst_16 = arith.constant dense<0.000000e+00> : vector<16x8x8xf32>
    %11 = tpu.matmul %3, %5, %cst_16 {dimension_numbers = #tpu.dot_dimension_numbers<[2], [1], [1], [2], [0, 0, 0, 1, 1, 2], [0], [0]>} : vector<16x8x8xbf16>, vector<16x8x8xbf16>, vector<16x8x8xf32> -> vector<16x8x8xf32>
    %12 = arith.subf %8, %9 : vector<16x8x8xf32>
    %c0_17 = arith.constant 0 : index
    %c0_18 = arith.constant 0 : index
    %c0_19 = arith.constant 0 : index
    %c0_20 = arith.constant 0 : index
    %13 = vector.load %arg3[%c0_17, %c0_18, %c0_19, %c0_20] : memref<2x16x8x8xf32, #tpu.memory_space<vmem>>, vector<1x16x8x8xf32>
    %14 = vector.shape_cast %13 : vector<1x16x8x8xf32> to vector<16x8x8xf32>
    %15 = vector.shape_cast %12 : vector<16x8x8xf32> to vector<1x16x8x8xf32>
    tpu.vector_store %arg3[%c0_17, %c0_18, %c0_19, %c0_20], %15 {strides = array<i32>} : memref<2x16x8x8xf32, #tpu.memory_space<vmem>>, vector<1x16x8x8xf32>,
    %16 = arith.addf %10, %11 : vector<16x8x8xf32>
    %c1_21 = arith.constant 1 : index
    %c0_22 = arith.constant 0 : index
    %c0_23 = arith.constant 0 : index
    %c0_24 = arith.constant 0 : index
    %17 = vector.load %arg3[%c1_21, %c0_22, %c0_23, %c0_24] : memref<2x16x8x8xf32, #tpu.memory_space<vmem>>, vector<1x16x8x8xf32>
    %18 = vector.shape_cast %17 : vector<1x16x8x8xf32> to vector<16x8x8xf32>
    %19 = vector.shape_cast %16 : vector<16x8x8xf32> to vector<1x16x8x8xf32>
    tpu.vector_store %arg3[%c1_21, %c0_22, %c0_23, %c0_24], %19 {strides = array<i32>} : memref<2x16x8x8xf32, #tpu.memory_space<vmem>>, vector<1x16x8x8xf32>,
    return
  }
  func.func @transform_0(%arg0: i32) -> (i32, i32, i32, i32) {
    %c0_i32 = arith.constant 0 : i32
    %c0_i32_0 = arith.constant 0 : i32
    %c0_i32_1 = arith.constant 0 : i32
    %c0_i32_2 = arith.constant 0 : i32
    return %c0_i32, %arg0, %c0_i32_0, %c0_i32_1 : i32, i32, i32, i32
  }
  func.func @transform_1(%arg0: i32) -> (i32, i32, i32, i32) {
    %c0_i32 = arith.constant 0 : i32
    %c0_i32_0 = arith.constant 0 : i32
    %c0_i32_1 = arith.constant 0 : i32
    %c0_i32_2 = arith.constant 0 : i32
    return %c0_i32, %arg0, %c0_i32_0, %c0_i32_1 : i32, i32, i32, i32
  }
  func.func @transform_2(%arg0: i32) -> (i32, i32, i32, i32) {
    %c0_i32 = arith.constant 0 : i32
    %c0_i32_0 = arith.constant 0 : i32
    %c0_i32_1 = arith.constant 0 : i32
    %c0_i32_2 = arith.constant 0 : i32
    return %c0_i32, %arg0, %c0_i32_0, %c0_i32_1 : i32, i32, i32, i32
  }
}

</mosaic_0001>

<bundles_post_ra>
// kernel: tpu_custom_call.1
= control target key start
LH: loop header
LB: loop body
LE: loop exit
PB: predicated region body
PF: predicated region fallthrough
CT: control target
= control target key end

     0   :  { %s4321_s9 = smov 0   ;;  %s4323_s10 = smov 0   ;;  %s5274_s0 = inlined_call_operand.vmem [shape: bf16[2,32,8,8], index: 0, kind: input, shape index: {}]   ;;  %s5275_s1 = inlined_call_operand.vmem [shape: bf16[2,32,8,8], index: 1, kind: input, shape index: {}]   ;;  %s5276_s2 = inlined_call_operand.vmem [shape: f32[2,32,8,8], index: 2, kind: output, shape index: {}]  }
   0x1   :  { %s4325_s11 = smov 0  }
   0x2 LB: > { %s3608_s12 = sadd.s32 4294967295, %s4302_s11   ;;  %s4338_s13 = sadd.s32 1, %s4302_s11   ;;  %s4302_s11 = sphi %s4325_s11, %s5284_s11   ;;  %s4298_s10 = sphi %s4323_s10, %s5283_s10   ;;  %s4294_s9 = sphi %s4321_s9, %s5282_s9  }
   0x3   : > { %s16_s14 = ssub.s32 %s4302_s11, %s4338_s13  ;;  %s19_s15 = sadd.s32 1, %s4298_s10 }
   0x4   : > { %p17_p0 = scmp.eq.s32.totalorder %s16_s14, 0  ;;  %p26_p1 = scmp.ne.s32.totalorder %s4298_s10, %s4294_s9 }
   0x5   : > { %p27_p2 = scmp.eq.s32.totalorder %s4302_s11, 0  ;;  %p82_p3 = scmp.eq.s32.totalorder %s3608_s12, 1 }
   0x6   : > { %s4349_s16 = scalar_select %p17_p0, %s4298_s10, %s19_s15  }
   0x7   : > { %p4351_p4 = por %p27_p2, %p26_p1  ;;  %p4355_p5 = por %p82_p3, %p26_p1 }
   0x8   : > { %p3611_p6 = scmp.ge.s32.totalorder %s4302_s11, 2 }
   0xa   : > { %104 = sbr.rel (%p3611_p6) target bundleno = 39 (0x27), region = 16 }
   0xf   : > { %107 = sbr.rel (!%p4351_p4) target bundleno = 27 (0x1b), region = 20  ;;  %s109_s19 = sand.u32 (%p4351_p4), 1, %s4298_s10  }
  0x10   : > { %s3739_s20 = sshll.u32 (%p4351_p4), %s4302_s11, 6  ;;  %s3612_s21 = sshll.u32 (%p4351_p4), %s109_s19, 7 }
  0x11   : > { %s4367_s24 = scalar_lea.vmem (%p4351_p4), %s5274_s0, %s3739_s20  ;;  %s111_s25 = scalar_lea.vmem (%p4351_p4), [#allocation2], %s3612_s21 }
  0x12   : > { %v131_v0 = vld [vmem:[%s4367_s24] sm:$0xff] (%p4351_p4)   ;;  %v135_v1 = vld [vmem:[%s4367_s24 + $0x8] sm:$0xff] (%p4351_p4)   ;;  %v139_v2 = vld [vmem:[%s4367_s24 + $0x10] sm:$0xff] (%p4351_p4)  }
  0x13   : > { %132 = vst [vmem:[%s111_s25] sm:$0xff] (%p4351_p4), %v131_v0   ;;  %136 = vst [vmem:[%s111_s25 + $0x8] sm:$0xff] (%p4351_p4), %v135_v1   ;;  %v143_v3 = vld [vmem:[%s4367_s24 + $0x18] sm:$0xff] (%p4351_p4)   ;;  %v147_v4 = vld [vmem:[%s4367_s24 + $0x20] sm:$0xff] (%p4351_p4)  }
  0x14   : > { %140 = vst [vmem:[%s111_s25 + $0x10] sm:$0xff] %v139_v2   ;;  %v151_v5 = vld [vmem:[%s4367_s24 + $0x28] sm:$0xff]   ;;  %144 = vst [vmem:[%s111_s25 + $0x18] sm:$0xff] %v143_v3   ;;  %v155_v6 = vld [vmem:[%s4367_s24 + $0x30] sm:$0xff]  }
  0x15   : > { %148 = vst [vmem:[%s111_s25 + $0x20] sm:$0xff] %v147_v4   ;;  %152 = vst [vmem:[%s111_s25 + $0x28] sm:$0xff] %v151_v5   ;;  %v159_v7 = vld [vmem:[%s4367_s24 + $0x38] sm:$0xff]   ;;  %v163_v8 = vld [vmem:[%s4367_s24 + $0x80] sm:$0xff]  }
  0x16   : > { %156 = vst [vmem:[%s111_s25 + $0x30] sm:$0xff] %v155_v6   ;;  %160 = vst [vmem:[%s111_s25 + $0x38] sm:$0xff] %v159_v7   ;;  %v167_v9 = vld [vmem:[%s4367_s24 + $0x88] sm:$0xff]   ;;  %v171_v10 = vld [vmem:[%s4367_s24 + $0x90] sm:$0xff]  }
  0x17   : > { %164 = vst [vmem:[%s111_s25 + $0x40] sm:$0xff] %v163_v8   ;;  %v175_v11 = vld [vmem:[%s4367_s24 + $0x98] sm:$0xff]   ;;  %168 = vst [vmem:[%s111_s25 + $0x48] sm:$0xff] %v167_v9   ;;  %v179_v12 = vld [vmem:[%s4367_s24 + $0xa0] sm:$0xff]  }
  0x18   : > { %172 = vst [vmem:[%s111_s25 + $0x50] sm:$0xff] %v171_v10   ;;  %176 = vst [vmem:[%s111_s25 + $0x58] sm:$0xff] %v175_v11   ;;  %v183_v13 = vld [vmem:[%s4367_s24 + $0xa8] sm:$0xff]   ;;  %v187_v14 = vld [vmem:[%s4367_s24 + $0xb0] sm:$0xff]  }
  0x19   : > { %180 = vst [vmem:[%s111_s25 + $0x60] sm:$0xff] %v179_v12   ;;  %184 = vst [vmem:[%s111_s25 + $0x68] sm:$0xff] %v183_v13   ;;  %v191_v15 = vld [vmem:[%s4367_s24 + $0xb8] sm:$0xff]  }
  0x1a   : > { %188 = vst [vmem:[%s111_s25 + $0x70] sm:$0xff] %v187_v14   ;;  %192 = vst [vmem:[%s111_s25 + $0x78] sm:$0xff] %v191_v15  }
  0x1b PF: > { %282 = sbr.rel (!%p4351_p4) target bundleno = 39 (0x27), region = 61  ;;  %s284_s26 = sand.u32 (%p4351_p4), 1, %s4298_s10  }
  0x1c   : > { %s3740_s27 = sshll.u32 (%p4351_p4), %s4302_s11, 6  ;;  %s3615_s28 = sshll.u32 (%p4351_p4), %s284_s26, 7 }
  0x1d   : > { %s4392_s3 = scalar_lea.vmem (%p4351_p4), %s5275_s1, %s3740_s27  ;;  %s286_s4 = scalar_lea.vmem (%p4351_p4), [#allocation3], %s3615_s28 }
  0x1e   : > { %v306_v16 = vld [vmem:[%s4392_s3] sm:$0xff] (%p4351_p4)   ;;  %v310_v17 = vld [vmem:[%s4392_s3 + $0x8] sm:$0xff] (%p4351_p4)   ;;  %v314_v18 = vld [vmem:[%s4392_s3 + $0x10] sm:$0xff] (%p4351_p4)  }
  0x1f   : > { %307 = vst [vmem:[%s286_s4] sm:$0xff] (%p4351_p4), %v306_v16   ;;  %311 = vst [vmem:[%s286_s4 + $0x8] sm:$0xff] (%p4351_p4), %v310_v17   ;;  %v318_v19 = vld [vmem:[%s4392_s3 + $0x18] sm:$0xff] (%p4351_p4)   ;;  %v322_v20 = vld [vmem:[%s4392_s3 + $0x20] sm:$0xff] (%p4351_p4)  }
  0x20   : > { %315 = vst [vmem:[%s286_s4 + $0x10] sm:$0xff] %v314_v18   ;;  %v326_v21 = vld [vmem:[%s4392_s3 + $0x28] sm:$0xff]   ;;  %319 = vst [vmem:[%s286_s4 + $0x18] sm:$0xff] %v318_v19   ;;  %v330_v22 = vld [vmem:[%s4392_s3 + $0x30] sm:$0xff]  }
  0x21   : > { %323 = vst [vmem:[%s286_s4 + $0x20] sm:$0xff] %v322_v20   ;;  %327 = vst [vmem:[%s286_s4 + $0x28] sm:$0xff] %v326_v21   ;;  %v334_v23 = vld [vmem:[%s4392_s3 + $0x38] sm:$0xff]   ;;  %v338_v24 = vld [vmem:[%s4392_s3 + $0x80] sm:$0xff]  }
  0x22   : > { %331 = vst [vmem:[%s286_s4 + $0x30] sm:$0xff] %v330_v22   ;;  %335 = vst [vmem:[%s286_s4 + $0x38] sm:$0xff] %v334_v23   ;;  %v342_v25 = vld [vmem:[%s4392_s3 + $0x88] sm:$0xff]   ;;  %v346_v26 = vld [vmem:[%s4392_s3 + $0x90] sm:$0xff]  }
  0x23   : > { %339 = vst [vmem:[%s286_s4 + $0x40] sm:$0xff] %v338_v24   ;;  %v350_v27 = vld [vmem:[%s4392_s3 + $0x98] sm:$0xff]   ;;  %343 = vst [vmem:[%s286_s4 + $0x48] sm:$0xff] %v342_v25   ;;  %v354_v28 = vld [vmem:[%s4392_s3 + $0xa0] sm:$0xff]  }
  0x24   : > { %347 = vst [vmem:[%s286_s4 + $0x50] sm:$0xff] %v346_v26   ;;  %351 = vst [vmem:[%s286_s4 + $0x58] sm:$0xff] %v350_v27   ;;  %v358_v29 = vld [vmem:[%s4392_s3 + $0xa8] sm:$0xff]   ;;  %v362_v30 = vld [vmem:[%s4392_s3 + $0xb0] sm:$0xff]  }
  0x25   : > { %355 = vst [vmem:[%s286_s4 + $0x60] sm:$0xff] %v354_v28   ;;  %359 = vst [vmem:[%s286_s4 + $0x68] sm:$0xff] %v358_v29   ;;  %v366_v31 = vld [vmem:[%s4392_s3 + $0xb8] sm:$0xff]  }
  0x26   : > { %363 = vst [vmem:[%s286_s4 + $0x70] sm:$0xff] %v362_v30   ;;  %367 = vst [vmem:[%s286_s4 + $0x78] sm:$0xff] %v366_v31  }
  0x27 PF: > { %p3618_p7 = scmp.ge.s32.totalorder %s4302_s11, 1  ;;  %p456_p8 = scmp.lt.s32.totalorder %s4302_s11, 3 }
  0x29   : > { %p457_p9 = pnand %p3618_p7, %p456_p8 }
  0x2b   : > { %460 = sbr.rel (%p457_p9) target bundleno = 508 (0x1fc), region = 102 }
  0x30   : > { %s463_s5 = sand.u32 1, %s4294_s9   ;;  %v4304_v32 = vmov 0.0   ;;  %vm568_vm0 = vcmask 1043456   ;;  %vm4305_vm1 = vmmov 0   ;;  %vm564_vm2 = vcmask 64512   ;;  %s3741_s9 = sshll.u32 (%p4355_p5), %s3608_s12, 7 }
  0x31   : > { %3870 = vmatprep.subr.bf16.mxu0 %v4304_v32  ;;  %3876 = vmatprep.subr.bf16.mxu1 %v4304_v32  ;;  %s3619_s6 = sshll.u32 %s463_s5, 7  ;;  %s3621_s14 = sshll.u32 %s463_s5, 8 }
  0x32   : > { %3872 = vmatprep.mubr.msk.bf16.mxu0 %vm4305_vm1, %v4304_v32  ;;  %3878 = vmatprep.mubr.msk.bf16.mxu1 %vm4305_vm1, %v4304_v32  ;;  %s4421_s7 = scalar_lea.vmem [#allocation3], %s3619_s6  ;;  %s4434_s8 = scalar_lea.vmem [#allocation2], %s3619_s6 }
  0x33   : > { %v531_v33 = vld [vmem:[%s4421_s7] sm:$0xf]  ;;  %v532_v34 = vld [vmem:[%s4421_s7 + $0x4] sm:$0xf]  ;;  %v533_v37 = vld [vmem:[%s4421_s7 + $0x8] sm:$0xf]  ;;  %s5201_s18 = scalar_lea.vmem (%p4355_p5), %s5276_s2, %s3741_s9 }
  0x34   : > { %v4426_v35 = vsel %vm568_vm0, %v531_v33, 0  ;;  %v4429_v36 = vsel %vm568_vm0, %v532_v34, 0  ;;  %v4437_v38 = vld [vmem:[%s4434_s8] sm:$0xf]  ;;  %v4440_v39 = vld [vmem:[%s4434_s8 + $0x4] sm:$0xf] }
  0x35   : > { %3871 = vmatpush3.bf16.msra.mxu0 %v4426_v35  ;;  %3877 = vmatpush3.bf16.msra.mxu1 %v4429_v36  ;;  %v534_v40 = vld [vmem:[%s4421_s7 + $0xc] sm:$0xf]  ;;  %v4446_v41 = vsel %vm568_vm0, %v533_v37, 0  ;;  %v535_v43 = vld [vmem:[%s4421_s7 + $0x10] sm:$0xf]  ;;  %s5063_s15 = scalar_lea.vmem [#allocation4], %s3621_s14 }
  0x36   : > { %3882 = vmatprep.subr.bf16.mxu0 %v4304_v32  ;;  %3888 = vmatprep.subr.bf16.mxu1 %v4304_v32  ;;  %v4449_v42 = vsel %vm568_vm0, %v534_v40, 0  ;;  %v536_v44 = vld [vmem:[%s4421_s7 + $0x14] sm:$0xf]  ;;  %v4466_v45 = vld [vmem:[%s4434_s8 + $0x8] sm:$0xf]  ;;  %v4472_v47 = vsel %vm568_vm0, %v535_v43, 0 }
  0x37   : > { %v4469_v46 = vld [vmem:[%s4434_s8 + $0xc] sm:$0xf]  ;;  %v4475_v48 = vsel %vm568_vm0, %v536_v44, 0  ;;  %v537_v49 = vld [vmem:[%s4421_s7 + $0x18] sm:$0xf] }
  0x38   : > { %3873 = vmatmul.mubr.msk.bf16.vlgmr.msra.gmra.mxu0 %vm564_vm2, %v4437_v38  ;;  %3879 = vmatmul.mubr.msk.bf16.vlgmr.msra.gmra.mxu1 %vm564_vm2, %v4440_v39  ;;  %v538_v50 = vld [vmem:[%s4421_s7 + $0x1c] sm:$0xf]  ;;  %v4492_v51 = vld [vmem:[%s4434_s8 + $0x10] sm:$0xf]  ;;  %v3640_v52 = vld [vmem:[%s4421_s7 + $0x48] sm:$0xf] }
  0x39   : > { %3883 = vmatpush3.bf16.msra.mxu0 %v4446_v41  ;;  %3889 = vmatpush3.bf16.msra.mxu1 %v4449_v42  ;;  %v4496_v53 = vld [vmem:[%s4434_s8 + $0x14] sm:$0xf]  ;;  %v4499_v54 = vsel %vm568_vm0, %v3640_v52, 0  ;;  %v3641_v55 = vld [vmem:[%s4421_s7 + $0x4c] sm:$0xf]  ;;  %v4503_v56 = vsel %vm568_vm0, %v537_v49, 0 }
  0x3a   : > { %3884 = vmatprep.mubr.msk.bf16.mxu0 %vm4305_vm1, %v4304_v32  ;;  %3890 = vmatprep.mubr.msk.bf16.mxu1 %vm4305_vm1, %v4304_v32  ;;  %v4506_v57 = vsel %vm568_vm0, %v538_v50, 0  ;;  %v4509_v58 = vsel %vm568_vm0, %v3641_v55, 0  ;;  %v3642_v59 = vld [vmem:[%s4421_s7 + $0x50] sm:$0xf]  ;;  %v3643_v61 = vld [vmem:[%s4421_s7 + $0x54] sm:$0xf] }
  0x3b   : > { %3894 = vmatprep.subr.bf16.mxu0 %v4304_v32  ;;  %3900 = vmatprep.subr.bf16.mxu1 %v4304_v32  ;;  %v4513_v60 = vsel %vm568_vm0, %v3642_v59, 0  ;;  %v4521_v62 = vsel %vm568_vm0, %v3643_v61, 0  ;;  %v3644_v63 = vld [vmem:[%s4421_s7 + $0x58] sm:$0xf]  ;;  %v3645_v1 = vld [vmem:[%s4421_s7 + $0x5c] sm:$0xf] }
  0x3c   : > { %v4527_v0 = vsel %vm568_vm0, %v3644_v63, 0  ;;  %v539_v2 = vld [vmem:[%s4421_s7 + $0x20] sm:$0xf]  ;;  %v4536_v3 = vsel %vm568_vm0, %v3645_v1, 0  ;;  %v540_v5 = vld [vmem:[%s4421_s7 + $0x24] sm:$0xf] }
  0x3d   : > { %v3646_v4 = vld [vmem:[%s4421_s7 + $0x60] sm:$0xf]  ;;  %v3647_v7 = vld [vmem:[%s4421_s7 + $0x64] sm:$0xf]  ;;  %v4547_v8 = vld [vmem:[%s4434_s8 + $0x18] sm:$0xf] }
  0x3e   : > { %v4543_v6 = vsel %vm568_vm0, %v3646_v4, 0  ;;  %v4550_v9 = vsel %vm568_vm0, %v3647_v7, 0  ;;  %v3648_v10 = vld [vmem:[%s4421_s7 + $0x68] sm:$0xf]  ;;  %v4554_v11 = vld [vmem:[%s4434_s8 + $0x1c] sm:$0xf] }
  0x3f   : > { %v4557_v12 = vsel %vm568_vm0, %v3648_v10, 0  ;;  %v3649_v13 = vld [vmem:[%s4421_s7 + $0x6c] sm:$0xf]  ;;  %v4561_v14 = vsel %vm568_vm0, %v539_v2, 0  ;;  %v4564_v15 = vsel %vm568_vm0, %v540_v5, 0 }
  0x40   : > { %3885 = vmatmul.mubr.msk.bf16.vlgmr.msra.gmra.mxu0 %vm564_vm2, %v4466_v45  ;;  %3891 = vmatmul.mubr.msk.bf16.vlgmr.msra.gmra.mxu1 %vm564_vm2, %v4469_v46  ;;  %v4567_v16 = vsel %vm568_vm0, %v3649_v13, 0  ;;  %v3650_v17 = vld [vmem:[%s4421_s7 + $0x70] sm:$0xf]  ;;  %v3651_v19 = vld [vmem:[%s4421_s7 + $0x74] sm:$0xf] }
  0x41   : > { %3895 = vmatpush3.bf16.msra.mxu0 %v4472_v47  ;;  %3901 = vmatpush3.bf16.msra.mxu1 %v4475_v48  ;;  %v4571_v18 = vsel %vm568_vm0, %v3650_v17, 0  ;;  %v4579_v20 = vsel %vm568_vm0, %v3651_v19, 0  ;;  %v3652_v21 = vld [vmem:[%s4421_s7 + $0x78] sm:$0xf]  ;;  %v3653_v23 = vld [vmem:[%s4421_s7 + $0x7c] sm:$0xf] }
  0x42   : > { %3896 = vmatprep.mubr.msk.bf16.mxu0 %vm4305_vm1, %v4304_v32  ;;  %3902 = vmatprep.mubr.msk.bf16.mxu1 %vm4305_vm1, %v4304_v32  ;;  %v4585_v22 = vsel %vm568_vm0, %v3652_v21, 0  ;;  %v4593_v24 = vsel %vm568_vm0, %v3653_v23, 0  ;;  %v541_v25 = vld [vmem:[%s4421_s7 + $0x28] sm:$0xf]  ;;  %v542_v26 = vld [vmem:[%s4421_s7 + $0x2c] sm:$0xf] }
  0x43   : > { %3906 = vmatprep.subr.bf16.mxu0 %v4304_v32  ;;  %3912 = vmatprep.subr.bf16.mxu1 %v4304_v32  ;;  %v4600_v27 = vld [vmem:[%s4434_s8 + $0x20] sm:$0xf]  ;;  %v4603_v28 = vld [vmem:[%s4434_s8 + $0x24] sm:$0xf]  ;;  %v4606_v29 = vsel %vm568_vm0, %v541_v25, 0  ;;  %v4609_v30 = vsel %vm568_vm0, %v542_v26, 0 }
  0x44   : > { %v543_v31 = vld [vmem:[%s4421_s7 + $0x30] sm:$0xf]  ;;  %v544_v33 = vld [vmem:[%s4421_s7 + $0x34] sm:$0xf]  ;;  %v4626_v34 = vld [vmem:[%s4434_s8 + $0x28] sm:$0xf] }
  0x45   : > { %v4629_v37 = vld [vmem:[%s4434_s8 + $0x2c] sm:$0xf]  ;;  %v4632_v40 = vsel %vm568_vm0, %v543_v31, 0  ;;  %v4635_v43 = vsel %vm568_vm0, %v544_v33, 0  ;;  %v545_v44 = vld [vmem:[%s4421_s7 + $0x38] sm:$0xf] }
  0x46   : > { %v546_v49 = vld [vmem:[%s4421_s7 + $0x3c] sm:$0xf]  ;;  %v4652_v50 = vld [vmem:[%s4434_s8 + $0x30] sm:$0xf]  ;;  %v4655_v52 = vld [vmem:[%s4434_s8 + $0x34] sm:$0xf] }
  0x47   : > { %v4658_v55 = vsel %vm568_vm0, %v545_v44, 0  ;;  %v4661_v59 = vsel %vm568_vm0, %v546_v49, 0  ;;  %v3638_v61 = vld [vmem:[%s4421_s7 + $0x40] sm:$0xf]  ;;  %v3639_v63 = vld [vmem:[%s4421_s7 + $0x44] sm:$0xf] }
  0x48   : > { %3897 = vmatmul.mubr.msk.bf16.vlgmr.msra.gmra.mxu0 %vm564_vm2, %v4492_v51  ;;  %3903 = vmatmul.mubr.msk.bf16.vlgmr.msra.gmra.mxu1 %vm564_vm2, %v4496_v53  ;;  %v4678_v1 = vld [vmem:[%s4434_s8 + $0x38] sm:$0xf]  ;;  %v4681_v2 = vld [vmem:[%s4434_s8 + $0x3c] sm:$0xf]  ;;  %v4684_v4 = vsel %vm568_vm0, %v3638_v61, 0  ;;  %v4687_v5 = vsel %vm568_vm0, %v3639_v63, 0 }
  0x49   : > { %3907 = vmatpush3.bf16.msra.mxu0 %v4503_v56  ;;  %3913 = vmatpush3.bf16.msra.mxu1 %v4506_v57  ;;  %5280 = vst [vmem:[#allocation5_spill] sm:$0xff] %v4681_v2  ;;  %v4702_v7 = vld [vmem:[%s4434_s8 + $0x40] sm:$0xf]  ;;  %v4705_v10 = vld [vmem:[%s4434_s8 + $0x44] sm:$0xf] }
  0x4a   : > { %3908 = vmatprep.mubr.msk.bf16.mxu0 %vm4305_vm1, %v4304_v32  ;;  %3914 = vmatprep.mubr.msk.bf16.mxu1 %vm4305_vm1, %v4304_v32  ;;  %v4720_v13 = vld [vmem:[%s4434_s8 + $0x48] sm:$0xf]  ;;  %v4723_v17 = vld [vmem:[%s4434_s8 + $0x4c] sm:$0xf]  ;;  %v4738_v19 = vld [vmem:[%s4434_s8 + $0x50] sm:$0xf] }
  0x4b   : > { %3918 = vmatprep.subr.bf16.mxu0 %v4304_v32  ;;  %3924 = vmatprep.subr.bf16.mxu1 %v4304_v32  ;;  %v4741_v21 = vld [vmem:[%s4434_s8 + $0x54] sm:$0xf]  ;;  %v4756_v23 = vld [vmem:[%s4434_s8 + $0x58] sm:$0xf]  ;;  %v4759_v25 = vld [vmem:[%s4434_s8 + $0x5c] sm:$0xf] }
  0x4c   : > { %v4774_v26 = vld [vmem:[%s4434_s8 + $0x60] sm:$0xf]  ;;  %v4777_v31 = vld [vmem:[%s4434_s8 + $0x64] sm:$0xf]  ;;  %v4792_v33 = vld [vmem:[%s4434_s8 + $0x68] sm:$0xf] }
  0x4d   : > { %v4795_v44 = vld [vmem:[%s4434_s8 + $0x6c] sm:$0xf]  ;;  %v4810_v49 = vld [vmem:[%s4434_s8 + $0x70] sm:$0xf]  ;;  %v4813_v61 = vld [vmem:[%s4434_s8 + $0x74] sm:$0xf] }
  0x4e   : > { %v4828_v63 = vld [vmem:[%s4434_s8 + $0x78] sm:$0xf] }
  0x50   : > { %3909 = vmatmul.mubr.msk.bf16.vlgmr.msra.gmra.mxu0 %vm564_vm2, %v4547_v8  ;;  %3915 = vmatmul.mubr.msk.bf16.vlgmr.msra.gmra.mxu1 %vm564_vm2, %v4554_v11 }
  0x51   : > { %3919 = vmatpush3.bf16.msra.mxu0 %v4561_v14  ;;  %3925 = vmatpush3.bf16.msra.mxu1 %v4564_v15 }
  0x52   : > { %3920 = vmatprep.mubr.msk.bf16.mxu0 %vm4305_vm1, %v4304_v32  ;;  %3926 = vmatprep.mubr.msk.bf16.mxu1 %vm4305_vm1, %v4304_v32 }
  0x53   : > { %3930 = vmatprep.subr.bf16.mxu0 %v4304_v32  ;;  %3936 = vmatprep.subr.bf16.mxu1 %v4304_v32 }
  0x58   : > { %3921 = vmatmul.mubr.msk.bf16.vlgmr.msra.gmra.mxu0 %vm564_vm2, %v4600_v27  ;;  %3927 = vmatmul.mubr.msk.bf16.vlgmr.msra.gmra.mxu1 %vm564_vm2, %v4603_v28 }
  0x59   : > { %3931 = vmatpush3.bf16.msra.mxu0 %v4606_v29  ;;  %3937 = vmatpush3.bf16.msra.mxu1 %v4609_v30 }
  0x5a   : > { %3932 = vmatprep.mubr.msk.bf16.mxu0 %vm4305_vm1, %v4304_v32  ;;  %3938 = vmatprep.mubr.msk.bf16.mxu1 %vm4305_vm1, %v4304_v32 }
  0x5b   : > { %3942 = vmatprep.subr.bf16.mxu0 %v4304_v32  ;;  %3948 = vmatprep.subr.bf16.mxu1 %v4304_v32 }
  0x60   : > { %3933 = vmatmul.mubr.msk.bf16.vlgmr.msra.gmra.mxu0 %vm564_vm2, %v4626_v34  ;;  %3939 = vmatmul.mubr.msk.bf16.vlgmr.msra.gmra.mxu1 %vm564_vm2, %v4629_v37 }
  0x61   : > { %3943 = vmatpush3.bf16.msra.mxu0 %v4632_v40  ;;  %3949 = vmatpush3.bf16.msra.mxu1 %v4635_v43 }
  0x62   : > { %3944 = vmatprep.mubr.msk.bf16.mxu0 %vm4305_vm1, %v4304_v32  ;;  %3950 = vmatprep.mubr.msk.bf16.mxu1 %vm4305_vm1, %v4304_v32 }
  0x63   : > { %3954 = vmatprep.subr.bf16.mxu0 %v4304_v32  ;;  %3960 = vmatprep.subr.bf16.mxu1 %v4304_v32 }
  0x68   : > { %3945 = vmatmul.mubr.msk.bf16.vlgmr.msra.gmra.mxu0 %vm564_vm2, %v4652_v50  ;;  %3951 = vmatmul.mubr.msk.bf16.vlgmr.msra.gmra.mxu1 %vm564_vm2, %v4655_v52 }
  0x69   : > { %3955 = vmatpush3.bf16.msra.mxu0 %v4658_v55  ;;  %3961 = vmatpush3.bf16.msra.mxu1 %v4661_v59 }
  0x6a   : > { %3956 = vmatprep.mubr.msk.bf16.mxu0 %vm4305_vm1, %v4304_v32  ;;  %3962 = vmatprep.mubr.msk.bf16.mxu1 %vm4305_vm1, %v4304_v32 }
  0x6b   : > { %3966 = vmatprep.subr.bf16.mxu0 %v4304_v32  ;;  %3972 = vmatprep.subr.bf16.mxu1 %v4304_v32 }
  0x70   : > { %3957 = vmatmul.mubr.msk.bf16.vlgmr.msra.gmra.mxu0 %vm564_vm2, %v4678_v1  ;;  %3963 = vmatmul.mubr.msk.bf16.vlgmr.msra.gmra.mxu1 %vm564_vm2, %v4681_v2  ;;  %v4831_v2 = vld [vmem:[%s4434_s8 + $0x7c] sm:$0xf] }
  0x71   : > { %3967 = vmatpush3.bf16.msra.mxu0 %v4684_v4  ;;  %3973 = vmatpush3.bf16.msra.mxu1 %v4687_v5 }
  0x72   : > { %3968 = vmatprep.mubr.msk.bf16.mxu0 %vm4305_vm1, %v4304_v32  ;;  %3974 = vmatprep.mubr.msk.bf16.mxu1 %vm4305_vm1, %v4304_v32 }
  0x73   : > { %3978 = vmatprep.subr.bf16.mxu0 %v4304_v32  ;;  %3984 = vmatprep.subr.bf16.mxu1 %v4304_v32 }
  0x78   : > { %3969 = vmatmul.mubr.msk.bf16.vlgmr.msra.gmra.mxu0 %vm564_vm2, %v4702_v7  ;;  %3975 = vmatmul.mubr.msk.bf16.vlgmr.msra.gmra.mxu1 %vm564_vm2, %v4705_v10 }
  0x79   : > { %3979 = vmatpush3.bf16.msra.mxu0 %v4499_v54  ;;  %3985 = vmatpush3.bf16.msra.mxu1 %v4509_v58 }
  0x7a   : > { %3980 = vmatprep.mubr.msk.bf16.mxu0 %vm4305_vm1, %v4304_v32  ;;  %3986 = vmatprep.mubr.msk.bf16.mxu1 %vm4305_vm1, %v4304_v32 }
  0x7b   : > { %3990 = vmatprep.subr.bf16.mxu0 %v4304_v32  ;;  %3996 = vmatprep.subr.bf16.mxu1 %v4304_v32 }
  0x80   : > { %3981 = vmatmul.mubr.msk.bf16.vlgmr.msra.gmra.mxu0 %vm564_vm2, %v4720_v13  ;;  %3987 = vmatmul.mubr.msk.bf16.vlgmr.msra.gmra.mxu1 %vm564_vm2, %v4723_v17 }
  0x81   : > { %3991 = vmatpush3.bf16.msra.mxu0 %v4513_v60  ;;  %3997 = vmatpush3.bf16.msra.mxu1 %v4521_v62 }
  0x82   : > { %3992 = vmatprep.mubr.msk.bf16.mxu0 %vm4305_vm1, %v4304_v32  ;;  %3998 = vmatprep.mubr.msk.bf16.mxu1 %vm4305_vm1, %v4304_v32 }
  0x83   : > { %4002 = vmatprep.subr.bf16.mxu0 %v4304_v32  ;;  %4008 = vmatprep.subr.bf16.mxu1 %v4304_v32 }
  0x88   : > { %3993 = vmatmul.mubr.msk.bf16.vlgmr.msra.gmra.mxu0 %vm564_vm2, %v4738_v19  ;;  %3999 = vmatmul.mubr.msk.bf16.vlgmr.msra.gmra.mxu1 %vm564_vm2, %v4741_v21 }
  0x89   : > { %4003 = vmatpush3.bf16.msra.mxu0 %v4527_v0  ;;  %4009 = vmatpush3.bf16.msra.mxu1 %v4536_v3 }
  0x8a   : > { %4004 = vmatprep.mubr.msk.bf16.mxu0 %vm4305_vm1, %v4304_v32  ;;  %4010 = vmatprep.mubr.msk.bf16.mxu1 %vm4305_vm1, %v4304_v32 }
  0x8b   : > { %4014 = vmatprep.subr.bf16.mxu0 %v4304_v32  ;;  %4020 = vmatprep.subr.bf16.mxu1 %v4304_v32 }
  0x90   : > { %4005 = vmatmul.mubr.msk.bf16.vlgmr.msra.gmra.mxu0 %vm564_vm2, %v4756_v23  ;;  %4011 = vmatmul.mubr.msk.bf16.vlgmr.msra.gmra.mxu1 %vm564_vm2, %v4759_v25 }
  0x91   : > { %4015 = vmatpush3.bf16.msra.mxu0 %v4543_v6  ;;  %4021 = vmatpush3.bf16.msra.mxu1 %v4550_v9 }
  0x92   : > { %4016 = vmatprep.mubr.msk.bf16.mxu0 %vm4305_vm1, %v4304_v32  ;;  %4022 = vmatprep.mubr.msk.bf16.mxu1 %vm4305_vm1, %v4304_v32 }
  0x93   : > { %4026 = vmatprep.subr.bf16.mxu0 %v4304_v32  ;;  %4032 = vmatprep.subr.bf16.mxu1 %v4304_v32 }
  0x98   : > { %4017 = vmatmul.mubr.msk.bf16.vlgmr.msra.gmra.mxu0 %vm564_vm2, %v4774_v26  ;;  %4023 = vmatmul.mubr.msk.bf16.vlgmr.msra.gmra.mxu1 %vm564_vm2, %v4777_v31 }
  0x99   : > { %4027 = vmatpush3.bf16.msra.mxu0 %v4557_v12  ;;  %4033 = vmatpush3.bf16.msra.mxu1 %v4567_v16 }
  0x9a   : > { %4028 = vmatprep.mubr.msk.bf16.mxu0 %vm4305_vm1, %v4304_v32  ;;  %4034 = vmatprep.mubr.msk.bf16.mxu1 %vm4305_vm1, %v4304_v32 }
  0x9b   : > { %4038 = vmatprep.subr.bf16.mxu0 %v4304_v32  ;;  %4044 = vmatprep.subr.bf16.mxu1 %v4304_v32 }
  0xa0   : > { %4029 = vmatmul.mubr.msk.bf16.vlgmr.msra.gmra.mxu0 %vm564_vm2, %v4792_v33  ;;  %4035 = vmatmul.mubr.msk.bf16.vlgmr.msra.gmra.mxu1 %vm564_vm2, %v4795_v44 }
  0xa1   : > { %4039 = vmatpush3.bf16.msra.mxu0 %v4571_v18  ;;  %4045 = vmatpush3.bf16.msra.mxu1 %v4579_v20 }
  0xa2   : > { %4040 = vmatprep.mubr.msk.bf16.mxu0 %vm4305_vm1, %v4304_v32  ;;  %4046 = vmatprep.mubr.msk.bf16.mxu1 %vm4305_vm1, %v4304_v32 }
  0xa3   : > { %4050 = vmatprep.subr.bf16.mxu0 %v4304_v32  ;;  %4056 = vmatprep.subr.bf16.mxu1 %v4304_v32 }
  0xa8   : > { %4041 = vmatmul.mubr.msk.bf16.vlgmr.msra.gmra.mxu0 %vm564_vm2, %v4810_v49  ;;  %4047 = vmatmul.mubr.msk.bf16.vlgmr.msra.gmra.mxu1 %vm564_vm2, %v4813_v61 }
  0xa9   : > { %4051 = vmatpush3.bf16.msra.mxu0 %v4585_v22  ;;  %4057 = vmatpush3.bf16.msra.mxu1 %v4593_v24 }
  0xaa   : > { %4052 = vmatprep.mubr.msk.bf16.mxu0 %vm4305_vm1, %v4304_v32  ;;  %4058 = vmatprep.mubr.msk.bf16.mxu1 %vm4305_vm1, %v4304_v32 }
  0xab   : > { %4062 = vmatprep.subr.bf16.mxu0 %v4304_v32  ;;  %4068 = vmatprep.subr.bf16.mxu1 %v4304_v32 }
  0xb0   : > { %4053 = vmatmul.mubr.msk.bf16.vlgmr.msra.gmra.mxu0 %vm564_vm2, %v4828_v63  ;;  %4059 = vmatmul.mubr.msk.bf16.vlgmr.msra.gmra.mxu1 %vm564_vm2, %v4831_v2 }
  0xb1   : > { %4063 = vmatpush3.bf16.msra.mxu0 %v4426_v35  ;;  %4069 = vmatpush3.bf16.msra.mxu1 %v4429_v36 }
  0xb2   : > { %4064 = vmatprep.mubr.msk.bf16.mxu0 %vm4305_vm1, %v4304_v32  ;;  %4070 = vmatprep.mubr.msk.bf16.mxu1 %vm4305_vm1, %v4304_v32 }
  0xb3   : > { %4074 = vmatprep.subr.bf16.mxu0 %v4304_v32  ;;  %4080 = vmatprep.subr.bf16.mxu1 %v4304_v32 }
  0xb8   : > { %4065 = vmatmul.mubr.msk.bf16.vlgmr.msra.gmra.mxu0 %vm564_vm2, %v4702_v7  ;;  %4071 = vmatmul.mubr.msk.bf16.vlgmr.msra.gmra.mxu1 %vm564_vm2, %v4705_v10 }
  0xb9   : > { %4075 = vmatpush3.bf16.msra.mxu0 %v4446_v41  ;;  %4081 = vmatpush3.bf16.msra.mxu1 %v4449_v42 }
  0xba   : > { %4076 = vmatprep.mubr.msk.bf16.mxu0 %vm4305_vm1, %v4304_v32  ;;  %4082 = vmatprep.mubr.msk.bf16.mxu1 %vm4305_vm1, %v4304_v32 }
  0xbb   : > { %4086 = vmatprep.subr.bf16.mxu0 %v4304_v32  ;;  %4092 = vmatprep.subr.bf16.mxu1 %v4304_v32 }
  0xc0   : > { %4077 = vmatmul.mubr.msk.bf16.vlgmr.msra.gmra.mxu0 %vm564_vm2, %v4720_v13  ;;  %4083 = vmatmul.mubr.msk.bf16.vlgmr.msra.gmra.mxu1 %vm564_vm2, %v4723_v17 }
  0xc1   : > { %4087 = vmatpush3.bf16.msra.mxu0 %v4472_v47  ;;  %4093 = vmatpush3.bf16.msra.mxu1 %v4475_v48 }
  0xc2   : > { %4088 = vmatprep.mubr.msk.bf16.mxu0 %vm4305_vm1, %v4304_v32  ;;  %4094 = vmatprep.mubr.msk.bf16.mxu1 %vm4305_vm1, %v4304_v32 }
  0xc3   : > { %4098 = vmatprep.subr.bf16.mxu0 %v4304_v32  ;;  %4104 = vmatprep.subr.bf16.mxu1 %v4304_v32 }
  0xc8   : > { %4089 = vmatmul.mubr.msk.bf16.vlgmr.msra.gmra.mxu0 %vm564_vm2, %v4738_v19  ;;  %4095 = vmatmul.mubr.msk.bf16.vlgmr.msra.gmra.mxu1 %vm564_vm2, %v4741_v21 }
  0xc9   : > { %4099 = vmatpush3.bf16.msra.mxu0 %v4503_v56  ;;  %4105 = vmatpush3.bf16.msra.mxu1 %v4506_v57 }
  0xca   : > { %4100 = vmatprep.mubr.msk.bf16.mxu0 %vm4305_vm1, %v4304_v32  ;;  %4106 = vmatprep.mubr.msk.bf16.mxu1 %vm4305_vm1, %v4304_v32 }
  0xcb   : > { %4110 = vmatprep.subr.bf16.mxu0 %v4304_v32  ;;  %4116 = vmatprep.subr.bf16.mxu1 %v4304_v32 }
  0xd0   : > { %4101 = vmatmul.mubr.msk.bf16.vlgmr.msra.gmra.mxu0 %vm564_vm2, %v4756_v23  ;;  %4107 = vmatmul.mubr.msk.bf16.vlgmr.msra.gmra.mxu1 %vm564_vm2, %v4759_v25 }
  0xd1   : > { %4111 = vmatpush3.bf16.msra.mxu0 %v4561_v14  ;;  %4117 = vmatpush3.bf16.msra.mxu1 %v4564_v15 }
  0xd2   : > { %4112 = vmatprep.mubr.msk.bf16.mxu0 %vm4305_vm1, %v4304_v32  ;;  %4118 = vmatprep.mubr.msk.bf16.mxu1 %vm4305_vm1, %v4304_v32 }
  0xd3   : > { %4122 = vmatprep.subr.bf16.mxu0 %v4304_v32  ;;  %4128 = vmatprep.subr.bf16.mxu1 %v4304_v32 }
  0xd8   : > { %4113 = vmatmul.mubr.msk.bf16.vlgmr.msra.gmra.mxu0 %vm564_vm2, %v4774_v26  ;;  %4119 = vmatmul.mubr.msk.bf16.vlgmr.msra.gmra.mxu1 %vm564_vm2, %v4777_v31 }
  0xd9   : > { %4123 = vmatpush3.bf16.msra.mxu0 %v4606_v29  ;;  %4129 = vmatpush3.bf16.msra.mxu1 %v4609_v30 }
  0xda   : > { %4124 = vmatprep.mubr.msk.bf16.mxu0 %vm4305_vm1, %v4304_v32  ;;  %4130 = vmatprep.mubr.msk.bf16.mxu1 %vm4305_vm1, %v4304_v32 }
  0xdb   : > { %4134 = vmatprep.subr.bf16.mxu0 %v4304_v32  ;;  %4140 = vmatprep.subr.bf16.mxu1 %v4304_v32 }
  0xe0   : > { %4125 = vmatmul.mubr.msk.bf16.vlgmr.msra.gmra.mxu0 %vm564_vm2, %v4792_v33  ;;  %4131 = vmatmul.mubr.msk.bf16.vlgmr.msra.gmra.mxu1 %vm564_vm2, %v4795_v44 }
  0xe1   : > { %4135 = vmatpush3.bf16.msra.mxu0 %v4632_v40  ;;  %4141 = vmatpush3.bf16.msra.mxu1 %v4635_v43 }
  0xe2   : > { %4136 = vmatprep.mubr.msk.bf16.mxu0 %vm4305_vm1, %v4304_v32  ;;  %4142 = vmatprep.mubr.msk.bf16.mxu1 %vm4305_vm1, %v4304_v32 }
  0xe3   : > { %4146 = vmatprep.subr.bf16.mxu0 %v4304_v32  ;;  %4152 = vmatprep.subr.bf16.mxu1 %v4304_v32 }
  0xe8   : > { %4137 = vmatmul.mubr.msk.bf16.vlgmr.msra.gmra.mxu0 %vm564_vm2, %v4810_v49  ;;  %4143 = vmatmul.mubr.msk.bf16.vlgmr.msra.gmra.mxu1 %vm564_vm2, %v4813_v61 }
  0xe9   : > { %4147 = vmatpush3.bf16.msra.mxu0 %v4658_v55  ;;  %4153 = vmatpush3.bf16.msra.mxu1 %v4661_v59 }
  0xea   : > { %4148 = vmatprep.mubr.msk.bf16.mxu0 %vm4305_vm1, %v4304_v32  ;;  %4154 = vmatprep.mubr.msk.bf16.mxu1 %vm4305_vm1, %v4304_v32 }
  0xeb   : > { %4158 = vmatprep.subr.bf16.mxu0 %v4304_v32  ;;  %4164 = vmatprep.subr.bf16.mxu1 %v4304_v32 }
  0xf0   : > { %4149 = vmatmul.mubr.msk.bf16.vlgmr.msra.gmra.mxu0 %vm564_vm2, %v4828_v63  ;;  %4155 = vmatmul.mubr.msk.bf16.vlgmr.msra.gmra.mxu1 %vm564_vm2, %v4831_v2 }
  0xf1   : > { %4159 = vmatpush3.bf16.msra.mxu0 %v4684_v4  ;;  %4165 = vmatpush3.bf16.msra.mxu1 %v4687_v5 }
  0xf2   : > { %4160 = vmatprep.mubr.msk.bf16.mxu0 %vm4305_vm1, %v4304_v32  ;;  %4166 = vmatprep.mubr.msk.bf16.mxu1 %vm4305_vm1, %v4304_v32 }
  0xf3   : > { %4170 = vmatprep.subr.bf16.mxu0 %v4304_v32  ;;  %4176 = vmatprep.subr.bf16.mxu1 %v4304_v32 }
  0xf8   : > { %v4941_v35 = vpop.f32.mrf.mxu0  ;;  %v4943_v36 = vpop.f32.mrf.mxu1  ;;  %4161 = vmatmul.mubr.msk.bf16.vlgmr.msra.gmra.mxu0 %vm564_vm2, %v4437_v38  ;;  %4167 = vmatmul.mubr.msk.bf16.vlgmr.msra.gmra.mxu1 %vm564_vm2, %v4440_v39 }
  0xf9   : > { %4171 = vmatpush3.bf16.msra.mxu0 %v4499_v54  ;;  %4177 = vmatpush3.bf16.msra.mxu1 %v4509_v58 }
  0xfa   : > { %v3874_v41 = vpop.f32.mrf.mxu0  ;;  %v3880_v42 = vpop.f32.mrf.mxu1  ;;  %4172 = vmatprep.mubr.msk.bf16.mxu0 %vm4305_vm1, %v4304_v32  ;;  %4178 = vmatprep.mubr.msk.bf16.mxu1 %vm4305_vm1, %v4304_v32 }
  0xfb   : > { %4182 = vmatprep.subr.bf16.mxu0 %v4304_v32  ;;  %4188 = vmatprep.subr.bf16.mxu1 %v4304_v32 }
  0xfc   : > { %v609_v38 = vpop.f32.mrf.mxu0  ;;  %v655_v47 = vpop.f32.mrf.mxu1 }
  0xfe   : > { %v3875_v48 = vpop.f32.mrf.mxu0  ;;  %v3881_v39 = vpop.f32.mrf.mxu1 }
 0x100   : > { %v4957_v56 = vpop.f32.mrf.mxu0  ;;  %v4959_v54 = vpop.f32.mrf.mxu1  ;;  %4173 = vmatmul.mubr.msk.bf16.vlgmr.msra.gmra.mxu0 %vm564_vm2, %v4466_v45  ;;  %4179 = vmatmul.mubr.msk.bf16.vlgmr.msra.gmra.mxu1 %vm564_vm2, %v4469_v46 }
 0x101   : > { %4183 = vmatpush3.bf16.msra.mxu0 %v4513_v60  ;;  %4189 = vmatpush3.bf16.msra.mxu1 %v4521_v62 }
 0x102   : > { %v3886_v57 = vpop.f32.mrf.mxu0  ;;  %v3892_v58 = vpop.f32.mrf.mxu1  ;;  %4184 = vmatprep.mubr.msk.bf16.mxu0 %vm4305_vm1, %v4304_v32  ;;  %4190 = vmatprep.mubr.msk.bf16.mxu1 %vm4305_vm1, %v4304_v32 }
 0x103   : > { %4194 = vmatprep.subr.bf16.mxu0 %v4304_v32  ;;  %4200 = vmatprep.subr.bf16.mxu1 %v4304_v32 }
 0x104   : > { %v701_v45 = vpop.f32.mrf.mxu0  ;;  %v747_v14 = vpop.f32.mrf.mxu1 }
 0x106   : > { %v3887_v15 = vpop.f32.mrf.mxu0  ;;  %v3893_v46 = vpop.f32.mrf.mxu1 }
 0x108   : > { %v4973_v29 = vpop.f32.mrf.mxu0  ;;  %v4975_v60 = vpop.f32.mrf.mxu1  ;;  %4185 = vmatmul.mubr.msk.bf16.vlgmr.msra.gmra.mxu0 %vm564_vm2, %v4492_v51  ;;  %4191 = vmatmul.mubr.msk.bf16.vlgmr.msra.gmra.mxu1 %vm564_vm2, %v4496_v53 }
 0x109   : > { %4195 = vmatpush3.bf16.msra.mxu0 %v4527_v0  ;;  %4201 = vmatpush3.bf16.msra.mxu1 %v4536_v3 }
 0x10a   : > { %v3898_v62 = vpop.f32.mrf.mxu0  ;;  %v3904_v30 = vpop.f32.mrf.mxu1  ;;  %4196 = vmatprep.mubr.msk.bf16.mxu0 %vm4305_vm1, %v4304_v32  ;;  %4202 = vmatprep.mubr.msk.bf16.mxu1 %vm4305_vm1, %v4304_v32 }
 0x10b   : > { %4206 = vmatprep.subr.bf16.mxu0 %v4304_v32  ;;  %4212 = vmatprep.subr.bf16.mxu1 %v4304_v32 }
 0x10c   : > { %v793_v51 = vpop.f32.mrf.mxu0  ;;  %v839_v40 = vpop.f32.mrf.mxu1 }
 0x10e   : > { %v3899_v43 = vpop.f32.mrf.mxu0  ;;  %v3905_v53 = vpop.f32.mrf.mxu1 }
 0x110   : > { %v4989_v55 = vpop.f32.mrf.mxu0  ;;  %v4991_v0 = vpop.f32.mrf.mxu1  ;;  %4197 = vmatmul.mubr.msk.bf16.vlgmr.msra.gmra.mxu0 %vm564_vm2, %v4547_v8  ;;  %4203 = vmatmul.mubr.msk.bf16.vlgmr.msra.gmra.mxu1 %vm564_vm2, %v4554_v11 }
 0x111   : > { %4207 = vmatpush3.bf16.msra.mxu0 %v4543_v6  ;;  %4213 = vmatpush3.bf16.msra.mxu1 %v4550_v9 }
 0x112   : > { %v3910_v3 = vpop.f32.mrf.mxu0  ;;  %v3916_v59 = vpop.f32.mrf.mxu1  ;;  %4208 = vmatprep.mubr.msk.bf16.mxu0 %vm4305_vm1, %v4304_v32  ;;  %4214 = vmatprep.mubr.msk.bf16.mxu1 %vm4305_vm1, %v4304_v32 }
 0x113   : > { %4218 = vmatprep.subr.bf16.mxu0 %v4304_v32  ;;  %4224 = vmatprep.subr.bf16.mxu1 %v4304_v32 }
 0x114   : > { %v885_v8 = vpop.f32.mrf.mxu0  ;;  %v931_v2 = vpop.f32.mrf.mxu1 }
 0x116   : > { %v3911_v4 = vpop.f32.mrf.mxu0  ;;  %v3917_v11 = vpop.f32.mrf.mxu1 }
 0x118   : > { %v5005_v5 = vpop.f32.mrf.mxu0  ;;  %v5007_v6 = vpop.f32.mrf.mxu1  ;;  %4209 = vmatmul.mubr.msk.bf16.vlgmr.msra.gmra.mxu0 %vm564_vm2, %v4600_v27  ;;  %4215 = vmatmul.mubr.msk.bf16.vlgmr.msra.gmra.mxu1 %vm564_vm2, %v4603_v28 }
 0x119   : > { %4219 = vmatpush3.bf16.msra.mxu0 %v4557_v12  ;;  %4225 = vmatpush3.bf16.msra.mxu1 %v4567_v16 }
 0x11a   : > { %v3922_v9 = vpop.f32.mrf.mxu0  ;;  %v3928_v7 = vpop.f32.mrf.mxu1  ;;  %4220 = vmatprep.mubr.msk.bf16.mxu0 %vm4305_vm1, %v4304_v32  ;;  %4226 = vmatprep.mubr.msk.bf16.mxu1 %vm4305_vm1, %v4304_v32 }
 0x11b   : > { %4230 = vmatprep.subr.bf16.mxu0 %v4304_v32  ;;  %4236 = vmatprep.subr.bf16.mxu1 %v4304_v32 }
 0x11c   : > { %v977_v27 = vpop.f32.mrf.mxu0  ;;  %v1023_v10 = vpop.f32.mrf.mxu1 }
 0x11e   : > { %v3923_v13 = vpop.f32.mrf.mxu0  ;;  %v3929_v28 = vpop.f32.mrf.mxu1 }
 0x120   : > { %v5021_v17 = vpop.f32.mrf.mxu0  ;;  %v5023_v12 = vpop.f32.mrf.mxu1  ;;  %4221 = vmatmul.mubr.msk.bf16.vlgmr.msra.gmra.mxu0 %vm564_vm2, %v4626_v34  ;;  %4227 = vmatmul.mubr.msk.bf16.vlgmr.msra.gmra.mxu1 %vm564_vm2, %v4629_v37 }
 0x121   : > { %4231 = vmatpush3.bf16.msra.mxu0 %v4571_v18  ;;  %4237 = vmatpush3.bf16.msra.mxu1 %v4579_v20 }
 0x122   : > { %v3934_v16 = vpop.f32.mrf.mxu0  ;;  %v3940_v19 = vpop.f32.mrf.mxu1  ;;  %4232 = vmatprep.mubr.msk.bf16.mxu0 %vm4305_vm1, %v4304_v32  ;;  %4238 = vmatprep.mubr.msk.bf16.mxu1 %vm4305_vm1, %v4304_v32 }
 0x123   : > { %4242 = vmatprep.subr.bf16.mxu0 %v4304_v32  ;;  %4248 = vmatprep.subr.bf16.mxu1 %v4304_v32 }
 0x124   : > { %v1069_v34 = vpop.f32.mrf.mxu0  ;;  %v1115_v21 = vpop.f32.mrf.mxu1 }
 0x126   : > { %v3935_v23 = vpop.f32.mrf.mxu0  ;;  %v3941_v37 = vpop.f32.mrf.mxu1 }
 0x128   : > { %v5037_v25 = vpop.f32.mrf.mxu0  ;;  %v5039_v18 = vpop.f32.mrf.mxu1  ;;  %4233 = vmatmul.mubr.msk.bf16.vlgmr.msra.gmra.mxu0 %vm564_vm2, %v4652_v50  ;;  %4239 = vmatmul.mubr.msk.bf16.vlgmr.msra.gmra.mxu1 %vm564_vm2, %v4655_v52 }
 0x129   : > { %4243 = vmatpush3.bf16.msra.mxu0 %v4585_v22  ;;  %4249 = vmatpush3.bf16.msra.mxu1 %v4593_v24  ;;  %v5281_v22 = vld [vmem:[#allocation5_spill] sm:$0xff] }
 0x12a   : > { %v3946_v20 = vpop.f32.mrf.mxu0  ;;  %v3952_v26 = vpop.f32.mrf.mxu1  ;;  %4244 = vmatprep.mubr.msk.bf16.mxu0 %vm4305_vm1, %v4304_v32  ;;  %4250 = vmatprep.mubr.msk.bf16.mxu1 %vm4305_vm1, %v4304_v32 }
 0x12c   : > { %v1161_v31 = vpop.f32.mrf.mxu0  ;;  %v1207_v33 = vpop.f32.mrf.mxu1 }
 0x12e   : > { %v3947_v44 = vpop.f32.mrf.mxu0  ;;  %v3953_v50 = vpop.f32.mrf.mxu1 }
 0x130   : > { %v5051_v49 = vpop.f32.mrf.mxu0  ;;  %v5053_v52 = vpop.f32.mrf.mxu1  ;;  %4245 = vmatmul.mubr.msk.bf16.vlgmr.msra.gmra.mxu0 %vm564_vm2, %v4678_v1  ;;  %4251 = vmatmul.mubr.msk.bf16.vlgmr.msra.gmra.mxu1 %vm564_vm2, %v5281_v22 }
 0x132   : > { %v3958_v24 = vpop.f32.mrf.mxu0  ;;  %v3964_v61 = vpop.f32.mrf.mxu1 }
 0x134   : > { %v1253_v63 = vpop.f32.mrf.mxu0  ;;  %v1299_v41 = vpop.f32.mrf.mxu1 }
 0x136   : > { %v3959_v32 = vpop.f32.mrf.mxu0  ;;  %v3965_v42 = vpop.f32.mrf.mxu1 }
 0x138   : > { %v1342_v38 = vpop.f32.mrf.mxu0  ;;  %v1388_v47 = vpop.f32.mrf.mxu1 }
 0x139   : > { %v2678_v48 = vsub.f32 %v4941_v35, %v1342_v38  ;;  %v2679_v39 = vsub.f32 %v4943_v36, %v1388_v47 }
 0x13a   : > { %v3970_v57 = vpop.f32.mrf.mxu0  ;;  %v3976_v58 = vpop.f32.mrf.mxu1 }
 0x13b   : > { %2694 = vst.msk [vmem:[%s5063_s15] sm:$0xff] %vm564_vm2, %v2678_v48  ;;  %2695 = vst.msk [vmem:[%s5063_s15 + $0x8] sm:$0xff] %vm564_vm2, %v2679_v39 }
 0x13c   : > { %v1345_v1 = vpop.f32.mrf.mxu0  ;;  %v1391_v45 = vpop.f32.mrf.mxu1 }
 0x13e   : > { %v3971_v14 = vpop.f32.mrf.mxu0  ;;  %v3977_v15 = vpop.f32.mrf.mxu1 }
 0x140   : > { %v1434_v46 = vpop.f32.mrf.mxu0  ;;  %v1480_v35 = vpop.f32.mrf.mxu1 }
 0x141   : > { %v2680_v36 = vsub.f32 %v4957_v56, %v1434_v46  ;;  %v2681_v62 = vsub.f32 %v4959_v54, %v1480_v35 }
 0x142   : > { %v3982_v30 = vpop.f32.mrf.mxu0  ;;  %v3988_v51 = vpop.f32.mrf.mxu1 }
 0x143   : > { %2696 = vst.msk [vmem:[%s5063_s15 + $0x10] sm:$0xff] %vm564_vm2, %v2680_v36  ;;  %2697 = vst.msk [vmem:[%s5063_s15 + $0x18] sm:$0xff] %vm564_vm2, %v2681_v62 }
 0x144   : > { %v1437_v40 = vpop.f32.mrf.mxu0  ;;  %v1483_v43 = vpop.f32.mrf.mxu1 }
 0x146   : > { %v3983_v53 = vpop.f32.mrf.mxu0  ;;  %v3989_v3 = vpop.f32.mrf.mxu1 }
 0x148   : > { %v1526_v59 = vpop.f32.mrf.mxu0  ;;  %v1572_v8 = vpop.f32.mrf.mxu1 }
 0x149   : > { %v2682_v2 = vsub.f32 %v4973_v29, %v1526_v59  ;;  %v2683_v56 = vsub.f32 %v4975_v60, %v1572_v8 }
 0x14a   : > { %v3994_v54 = vpop.f32.mrf.mxu0  ;;  %v4000_v4 = vpop.f32.mrf.mxu1 }
 0x14b   : > { %2698 = vst.msk [vmem:[%s5063_s15 + $0x20] sm:$0xff] %vm564_vm2, %v2682_v2  ;;  %2699 = vst.msk [vmem:[%s5063_s15 + $0x28] sm:$0xff] %vm564_vm2, %v2683_v56 }
 0x14c   : > { %v1529_v11 = vpop.f32.mrf.mxu0  ;;  %v1575_v9 = vpop.f32.mrf.mxu1 }
 0x14e   : > { %v3995_v7 = vpop.f32.mrf.mxu0  ;;  %v4001_v27 = vpop.f32.mrf.mxu1 }
 0x150   : > { %v1618_v10 = vpop.f32.mrf.mxu0  ;;  %v1664_v13 = vpop.f32.mrf.mxu1 }
 0x151   : > { %v2684_v28 = vsub.f32 %v4989_v55, %v1618_v10  ;;  %v2685_v29 = vsub.f32 %v4991_v0, %v1664_v13 }
 0x152   : > { %v4006_v60 = vpop.f32.mrf.mxu0  ;;  %v4012_v16 = vpop.f32.mrf.mxu1 }
 0x153   : > { %2700 = vst.msk [vmem:[%s5063_s15 + $0x30] sm:$0xff] %vm564_vm2, %v2684_v28  ;;  %2701 = vst.msk [vmem:[%s5063_s15 + $0x38] sm:$0xff] %vm564_vm2, %v2685_v29 }
 0x154   : > { %v1621_v19 = vpop.f32.mrf.mxu0  ;;  %v1667_v34 = vpop.f32.mrf.mxu1 }
 0x156   : > { %v4007_v21 = vpop.f32.mrf.mxu0  ;;  %v4013_v23 = vpop.f32.mrf.mxu1 }
 0x158   : > { %v1710_v37 = vpop.f32.mrf.mxu0  ;;  %v1756_v20 = vpop.f32.mrf.mxu1 }
 0x159   : > { %v2686_v26 = vsub.f32 %v5005_v5, %v1710_v37  ;;  %v2687_v55 = vsub.f32 %v5007_v6, %v1756_v20 }
 0x15a   : > { %v4018_v0 = vpop.f32.mrf.mxu0  ;;  %v4024_v31 = vpop.f32.mrf.mxu1 }
 0x15b   : > { %2702 = vst.msk [vmem:[%s5063_s15 + $0x40] sm:$0xff] %vm564_vm2, %v2686_v26  ;;  %2703 = vst.msk [vmem:[%s5063_s15 + $0x48] sm:$0xff] %vm564_vm2, %v2687_v55 }
 0x15c   : > { %v1713_v33 = vpop.f32.mrf.mxu0  ;;  %v1759_v44 = vpop.f32.mrf.mxu1 }
 0x15e   : > { %v4019_v50 = vpop.f32.mrf.mxu0  ;;  %v4025_v22 = vpop.f32.mrf.mxu1 }
 0x160   : > { %v1802_v24 = vpop.f32.mrf.mxu0  ;;  %v1848_v61 = vpop.f32.mrf.mxu1 }
 0x161   : > { %v2688_v63 = vsub.f32 %v5021_v17, %v1802_v24  ;;  %v2689_v5 = vsub.f32 %v5023_v12, %v1848_v61 }
 0x162   : > { %v4030_v6 = vpop.f32.mrf.mxu0  ;;  %v4036_v41 = vpop.f32.mrf.mxu1 }
 0x163   : > { %2704 = vst.msk [vmem:[%s5063_s15 + $0x50] sm:$0xff] %vm564_vm2, %v2688_v63  ;;  %2705 = vst.msk [vmem:[%s5063_s15 + $0x58] sm:$0xff] %vm564_vm2, %v2689_v5 }
 0x164   : > { %v1805_v32 = vpop.f32.mrf.mxu0  ;;  %v1851_v42 = vpop.f32.mrf.mxu1 }
 0x166   : > { %v4031_v38 = vpop.f32.mrf.mxu0  ;;  %v4037_v47 = vpop.f32.mrf.mxu1 }
 0x168   : > { %v1894_v48 = vpop.f32.mrf.mxu0  ;;  %v1940_v39 = vpop.f32.mrf.mxu1 }
 0x169   : > { %v2690_v57 = vsub.f32 %v5037_v25, %v1894_v48  ;;  %v2691_v17 = vsub.f32 %v5039_v18, %v1940_v39 }
 0x16a   : > { %v4042_v12 = vpop.f32.mrf.mxu0  ;;  %v4048_v58 = vpop.f32.mrf.mxu1 }
 0x16b   : > { %2706 = vst.msk [vmem:[%s5063_s15 + $0x60] sm:$0xff] %vm564_vm2, %v2690_v57  ;;  %2707 = vst.msk [vmem:[%s5063_s15 + $0x68] sm:$0xff] %vm564_vm2, %v2691_v17 }
 0x16c   : > { %v1897_v1 = vpop.f32.mrf.mxu0  ;;  %v1943_v45 = vpop.f32.mrf.mxu1 }
 0x16e   : > { %v4043_v14 = vpop.f32.mrf.mxu0  ;;  %v4049_v15 = vpop.f32.mrf.mxu1 }
 0x170   : > { %v1986_v46 = vpop.f32.mrf.mxu0  ;;  %v2032_v35 = vpop.f32.mrf.mxu1 }
 0x171   : > { %v2692_v36 = vsub.f32 %v5051_v49, %v1986_v46  ;;  %v2693_v25 = vsub.f32 %v5053_v52, %v2032_v35 }
 0x172   : > { %v4054_v62 = vpop.f32.mrf.mxu0  ;;  %v4060_v30 = vpop.f32.mrf.mxu1 }
 0x173   : > { %2708 = vst.msk [vmem:[%s5063_s15 + $0x70] sm:$0xff] %vm564_vm2, %v2692_v36  ;;  %2709 = vst.msk [vmem:[%s5063_s15 + $0x78] sm:$0xff] %vm564_vm2, %v2693_v25 }
 0x174   : > { %v1989_v18 = vpop.f32.mrf.mxu0  ;;  %v2035_v51 = vpop.f32.mrf.mxu1 }
 0x176   : > { %v4055_v40 = vpop.f32.mrf.mxu0  ;;  %v4061_v43 = vpop.f32.mrf.mxu1 }
 0x178   : > { %v5111_v53 = vpop.f32.mrf.mxu0  ;;  %v5113_v3 = vpop.f32.mrf.mxu1 }
 0x17a   : > { %v4066_v59 = vpop.f32.mrf.mxu0  ;;  %v4072_v8 = vpop.f32.mrf.mxu1 }
 0x17c   : > { %v2075_v2 = vpop.f32.mrf.mxu0  ;;  %v2115_v49 = vpop.f32.mrf.mxu1 }
 0x17e   : > { %v4067_v56 = vpop.f32.mrf.mxu0  ;;  %v4073_v52 = vpop.f32.mrf.mxu1 }
 0x180   : > { %v5115_v54 = vpop.f32.mrf.mxu0  ;;  %v5117_v4 = vpop.f32.mrf.mxu1 }
 0x182   : > { %v4078_v11 = vpop.f32.mrf.mxu0  ;;  %v4084_v9 = vpop.f32.mrf.mxu1 }
 0x184   : > { %v2155_v7 = vpop.f32.mrf.mxu0  ;;  %v2195_v27 = vpop.f32.mrf.mxu1 }
 0x186   : > { %v4079_v10 = vpop.f32.mrf.mxu0  ;;  %v4085_v13 = vpop.f32.mrf.mxu1 }
 0x188   : > { %v5119_v28 = vpop.f32.mrf.mxu0  ;;  %v5121_v29 = vpop.f32.mrf.mxu1 }
 0x18a   : > { %v4090_v60 = vpop.f32.mrf.mxu0  ;;  %v4096_v16 = vpop.f32.mrf.mxu1 }
 0x18c   : > { %v2235_v19 = vpop.f32.mrf.mxu0  ;;  %v2275_v34 = vpop.f32.mrf.mxu1 }
 0x18e   : > { %v4091_v21 = vpop.f32.mrf.mxu0  ;;  %v4097_v23 = vpop.f32.mrf.mxu1 }
 0x190   : > { %v5123_v37 = vpop.f32.mrf.mxu0  ;;  %v5125_v20 = vpop.f32.mrf.mxu1 }
 0x192   : > { %v4102_v26 = vpop.f32.mrf.mxu0  ;;  %v4108_v55 = vpop.f32.mrf.mxu1 }
 0x194   : > { %v2315_v0 = vpop.f32.mrf.mxu0  ;;  %v2355_v31 = vpop.f32.mrf.mxu1 }
 0x196   : > { %v4103_v33 = vpop.f32.mrf.mxu0  ;;  %v4109_v44 = vpop.f32.mrf.mxu1 }
 0x198   : > { %v5127_v50 = vpop.f32.mrf.mxu0  ;;  %v5129_v22 = vpop.f32.mrf.mxu1 }
 0x19a   : > { %v4114_v24 = vpop.f32.mrf.mxu0  ;;  %v4120_v61 = vpop.f32.mrf.mxu1 }
 0x19c   : > { %v2395_v63 = vpop.f32.mrf.mxu0  ;;  %v2435_v5 = vpop.f32.mrf.mxu1 }
 0x19e   : > { %v4115_v6 = vpop.f32.mrf.mxu0  ;;  %v4121_v41 = vpop.f32.mrf.mxu1 }
 0x1a0   : > { %v5131_v32 = vpop.f32.mrf.mxu0  ;;  %v5133_v42 = vpop.f32.mrf.mxu1 }
 0x1a2   : > { %v4126_v38 = vpop.f32.mrf.mxu0  ;;  %v4132_v47 = vpop.f32.mrf.mxu1 }
 0x1a4   : > { %v2475_v48 = vpop.f32.mrf.mxu0  ;;  %v2515_v39 = vpop.f32.mrf.mxu1 }
 0x1a6   : > { %v4127_v57 = vpop.f32.mrf.mxu0  ;;  %v4133_v17 = vpop.f32.mrf.mxu1 }
 0x1a8   : > { %v5135_v12 = vpop.f32.mrf.mxu0  ;;  %v5137_v58 = vpop.f32.mrf.mxu1 }
 0x1aa   : > { %v4138_v1 = vpop.f32.mrf.mxu0  ;;  %v4144_v45 = vpop.f32.mrf.mxu1 }
 0x1ac   : > { %v2555_v14 = vpop.f32.mrf.mxu0  ;;  %v2595_v15 = vpop.f32.mrf.mxu1 }
 0x1ae   : > { %v4139_v46 = vpop.f32.mrf.mxu0  ;;  %v4145_v35 = vpop.f32.mrf.mxu1 }
 0x1b0   : > { %v5139_v36 = vpop.f32.mrf.mxu0  ;;  %v5141_v25 = vpop.f32.mrf.mxu1 }
 0x1b2   : > { %v4150_v62 = vpop.f32.mrf.mxu0  ;;  %v4156_v30 = vpop.f32.mrf.mxu1 }
 0x1b4   : > { %v2635_v18 = vpop.f32.mrf.mxu0  ;;  %v2675_v51 = vpop.f32.mrf.mxu1 }
 0x1b6   : > { %v4151_v40 = vpop.f32.mrf.mxu0  ;;  %v4157_v43 = vpop.f32.mrf.mxu1 }
 0x1b8   : > { %v2744_v59 = vpop.f32.mrf.mxu0  ;;  %v2784_v8 = vpop.f32.mrf.mxu1 }
 0x1b9   : > { %v2745_v2 = vadd.f32 %v2744_v59, %v5111_v53  ;;  %v2785_v49 = vadd.f32 %v2784_v8, %v5113_v3 }
 0x1ba   : > { %v4162_v56 = vpop.f32.mrf.mxu0  ;;  %v4168_v52 = vpop.f32.mrf.mxu1 }
 0x1bb   : > { %3718 = vst.msk [vmem:[%s5063_s15 + $0x80] sm:$0xff] %vm564_vm2, %v2745_v2  ;;  %3719 = vst.msk [vmem:[%s5063_s15 + $0x88] sm:$0xff] %vm564_vm2, %v2785_v49 }
 0x1bc   : > { %v2747_v11 = vpop.f32.mrf.mxu0  ;;  %v2787_v9 = vpop.f32.mrf.mxu1 }
 0x1be   : > { %v4163_v7 = vpop.f32.mrf.mxu0  ;;  %v4169_v27 = vpop.f32.mrf.mxu1 }
 0x1c0   : > { %v2824_v10 = vpop.f32.mrf.mxu0  ;;  %v2864_v13 = vpop.f32.mrf.mxu1 }
 0x1c1   : > { %v2825_v60 = vadd.f32 %v2824_v10, %v5115_v54  ;;  %v2865_v53 = vadd.f32 %v2864_v13, %v5117_v4 }
 0x1c2   : > { %v4174_v3 = vpop.f32.mrf.mxu0  ;;  %v4180_v16 = vpop.f32.mrf.mxu1 }
 0x1c3   : > { %3720 = vst.msk [vmem:[%s5063_s15 + $0x90] sm:$0xff] %vm564_vm2, %v2825_v60  ;;  %3721 = vst.msk [vmem:[%s5063_s15 + $0x98] sm:$0xff] %vm564_vm2, %v2865_v53 }
 0x1c4   : > { %v2827_v19 = vpop.f32.mrf.mxu0  ;;  %v2867_v34 = vpop.f32.mrf.mxu1 }
 0x1c6   : > { %v4175_v21 = vpop.f32.mrf.mxu0  ;;  %v4181_v23 = vpop.f32.mrf.mxu1 }
 0x1c7   : > { %v3471_v21 = vld [vmem:[%s5063_s15 + $0x10] sm:$0xff] (%p4355_p5)  ;;  %v3473_v23 = vld [vmem:[%s5063_s15 + $0x18] sm:$0xff] (%p4355_p5) }
 0x1c8   : > { %v2904_v26 = vpop.f32.mrf.mxu0  ;;  %v2944_v55 = vpop.f32.mrf.mxu1  ;;  %3472 = vst [vmem:[%s5201_s18 + $0x10] sm:$0xff] (%p4355_p5), %v3471_v21  ;;  %3474 = vst [vmem:[%s5201_s18 + $0x18] sm:$0xff] (%p4355_p5), %v3473_v23 }
 0x1c9   : > { %v2905_v0 = vadd.f32 %v2904_v26, %v5119_v28  ;;  %v2945_v54 = vadd.f32 %v2944_v55, %v5121_v29  ;;  %v3475_v26 = vld [vmem:[%s5063_s15 + $0x20] sm:$0xff] (%p4355_p5)  ;;  %v3477_v55 = vld [vmem:[%s5063_s15 + $0x28] sm:$0xff] (%p4355_p5) }
 0x1ca   : > { %v4186_v4 = vpop.f32.mrf.mxu0  ;;  %v4192_v31 = vpop.f32.mrf.mxu1  ;;  %3476 = vst [vmem:[%s5201_s18 + $0x20] sm:$0xff] (%p4355_p5), %v3475_v26  ;;  %3478 = vst [vmem:[%s5201_s18 + $0x28] sm:$0xff] (%p4355_p5), %v3477_v55 }
 0x1cb   : > { %3722 = vst.msk [vmem:[%s5063_s15 + $0xa0] sm:$0xff] %vm564_vm2, %v2905_v0  ;;  %3723 = vst.msk [vmem:[%s5063_s15 + $0xa8] sm:$0xff] %vm564_vm2, %v2945_v54  ;;  %v3479_v0 = vld [vmem:[%s5063_s15 + $0x30] sm:$0xff] (%p4355_p5)  ;;  %v3481_v54 = vld [vmem:[%s5063_s15 + $0x38] sm:$0xff] (%p4355_p5) }
 0x1cc   : > { %v2907_v33 = vpop.f32.mrf.mxu0  ;;  %v2947_v44 = vpop.f32.mrf.mxu1  ;;  %v3483_v4 = vld [vmem:[%s5063_s15 + $0x40] sm:$0xff] (%p4355_p5)  ;;  %3480 = vst [vmem:[%s5201_s18 + $0x30] sm:$0xff] (%p4355_p5), %v3479_v0  ;;  %3482 = vst [vmem:[%s5201_s18 + $0x38] sm:$0xff] (%p4355_p5), %v3481_v54  ;;  %v3485_v31 = vld [vmem:[%s5063_s15 + $0x48] sm:$0xff] (%p4355_p5) }
 0x1cd   : > { %3484 = vst [vmem:[%s5201_s18 + $0x40] sm:$0xff] (%p4355_p5), %v3483_v4  ;;  %v3487_v33 = vld [vmem:[%s5063_s15 + $0x50] sm:$0xff] (%p4355_p5)  ;;  %v3489_v44 = vld [vmem:[%s5063_s15 + $0x58] sm:$0xff] (%p4355_p5)  ;;  %3486 = vst [vmem:[%s5201_s18 + $0x48] sm:$0xff] (%p4355_p5), %v3485_v31 }
 0x1ce   : > { %v4187_v24 = vpop.f32.mrf.mxu0  ;;  %v4193_v61 = vpop.f32.mrf.mxu1  ;;  %3488 = vst [vmem:[%s5201_s18 + $0x50] sm:$0xff] (%p4355_p5), %v3487_v33  ;;  %3490 = vst [vmem:[%s5201_s18 + $0x58] sm:$0xff] (%p4355_p5), %v3489_v44 }
 0x1cf   : > { %v3491_v24 = vld [vmem:[%s5063_s15 + $0x60] sm:$0xff] (%p4355_p5)  ;;  %v3493_v61 = vld [vmem:[%s5063_s15 + $0x68] sm:$0xff] (%p4355_p5) }
 0x1d0   : > { %v2984_v63 = vpop.f32.mrf.mxu0  ;;  %v3024_v5 = vpop.f32.mrf.mxu1  ;;  %3492 = vst [vmem:[%s5201_s18 + $0x60] sm:$0xff] (%p4355_p5), %v3491_v24  ;;  %3494 = vst [vmem:[%s5201_s18 + $0x68] sm:$0xff] (%p4355_p5), %v3493_v61 }
 0x1d1   : > { %v2985_v6 = vadd.f32 %v2984_v63, %v5123_v37  ;;  %v3025_v28 = vadd.f32 %v3024_v5, %v5125_v20  ;;  %v3495_v63 = vld [vmem:[%s5063_s15 + $0x70] sm:$0xff] (%p4355_p5)  ;;  %v3497_v5 = vld [vmem:[%s5063_s15 + $0x78] sm:$0xff] (%p4355_p5) }
 0x1d2   : > { %v4198_v29 = vpop.f32.mrf.mxu0  ;;  %v4204_v41 = vpop.f32.mrf.mxu1  ;;  %3496 = vst [vmem:[%s5201_s18 + $0x70] sm:$0xff] (%p4355_p5), %v3495_v63  ;;  %3498 = vst [vmem:[%s5201_s18 + $0x78] sm:$0xff] (%p4355_p5), %v3497_v5 }
 0x1d3   : > { %3724 = vst.msk [vmem:[%s5063_s15 + $0xb0] sm:$0xff] %vm564_vm2, %v2985_v6  ;;  %3725 = vst.msk [vmem:[%s5063_s15 + $0xb8] sm:$0xff] %vm564_vm2, %v3025_v28  ;;  %v3499_v6 = vld [vmem:[%s5063_s15 + $0x80] sm:$0xff] (%p4355_p5)  ;;  %v3501_v28 = vld [vmem:[%s5063_s15 + $0x88] sm:$0xff] (%p4355_p5) }
 0x1d4   : > { %v2987_v38 = vpop.f32.mrf.mxu0  ;;  %v3027_v47 = vpop.f32.mrf.mxu1  ;;  %3500 = vst [vmem:[%s5201_s18 + $0x100] sm:$0xff] (%p4355_p5), %v3499_v6  ;;  %3502 = vst [vmem:[%s5201_s18 + $0x108] sm:$0xff] (%p4355_p5), %v3501_v28  ;;  %v3503_v29 = vld [vmem:[%s5063_s15 + $0x90] sm:$0xff] (%p4355_p5)  ;;  %v3505_v41 = vld [vmem:[%s5063_s15 + $0x98] sm:$0xff] (%p4355_p5) }
 0x1d5   : > { %v3507_v38 = vld [vmem:[%s5063_s15 + $0xa0] sm:$0xff] (%p4355_p5)  ;;  %3504 = vst [vmem:[%s5201_s18 + $0x110] sm:$0xff] (%p4355_p5), %v3503_v29  ;;  %3506 = vst [vmem:[%s5201_s18 + $0x118] sm:$0xff] (%p4355_p5), %v3505_v41  ;;  %v3509_v47 = vld [vmem:[%s5063_s15 + $0xa8] sm:$0xff] (%p4355_p5) }
 0x1d6   : > { %v4199_v48 = vpop.f32.mrf.mxu0  ;;  %v4205_v39 = vpop.f32.mrf.mxu1  ;;  %3508 = vst [vmem:[%s5201_s18 + $0x120] sm:$0xff] (%p4355_p5), %v3507_v38  ;;  %3510 = vst [vmem:[%s5201_s18 + $0x128] sm:$0xff] (%p4355_p5), %v3509_v47 }
 0x1d8   : > { %v3064_v57 = vpop.f32.mrf.mxu0  ;;  %v3104_v17 = vpop.f32.mrf.mxu1 }
 0x1d9   : > { %v3065_v1 = vadd.f32 %v3064_v57, %v5127_v50  ;;  %v3105_v37 = vadd.f32 %v3104_v17, %v5129_v22 }
 0x1da   : > { %v4210_v20 = vpop.f32.mrf.mxu0  ;;  %v4216_v45 = vpop.f32.mrf.mxu1  ;;  %v3511_v48 = vld [vmem:[%s5063_s15 + $0xb0] sm:$0xff] (%p4355_p5)  ;;  %v3513_v39 = vld [vmem:[%s5063_s15 + $0xb8] sm:$0xff] (%p4355_p5) }
 0x1db   : > { %3726 = vst.msk [vmem:[%s5063_s15 + $0xc0] sm:$0xff] %vm564_vm2, %v3065_v1  ;;  %3727 = vst.msk [vmem:[%s5063_s15 + $0xc8] sm:$0xff] %vm564_vm2, %v3105_v37 }
 0x1dc   : > { %v3067_v14 = vpop.f32.mrf.mxu0  ;;  %v3107_v15 = vpop.f32.mrf.mxu1  ;;  %3512 = vst [vmem:[%s5201_s18 + $0x130] sm:$0xff] (%p4355_p5), %v3511_v48  ;;  %3514 = vst [vmem:[%s5201_s18 + $0x138] sm:$0xff] (%p4355_p5), %v3513_v39 }
 0x1de   : > { %v4211_v46 = vpop.f32.mrf.mxu0  ;;  %v4217_v35 = vpop.f32.mrf.mxu1 }
 0x1e0   : > { %v3144_v62 = vpop.f32.mrf.mxu0  ;;  %v3184_v30 = vpop.f32.mrf.mxu1 }
 0x1e1   : > { %v3145_v18 = vadd.f32 %v3144_v62, %v5131_v32  ;;  %v3185_v50 = vadd.f32 %v3184_v30, %v5133_v42 }
 0x1e2   : > { %v4222_v22 = vpop.f32.mrf.mxu0  ;;  %v4228_v51 = vpop.f32.mrf.mxu1  ;;  %v3515_v57 = vld [vmem:[%s5063_s15 + $0xc0] sm:$0xff] (%p4355_p5)  ;;  %v3517_v17 = vld [vmem:[%s5063_s15 + $0xc8] sm:$0xff] (%p4355_p5) }
 0x1e3   : > { %3728 = vst.msk [vmem:[%s5063_s15 + $0xd0] sm:$0xff] %vm564_vm2, %v3145_v18  ;;  %3729 = vst.msk [vmem:[%s5063_s15 + $0xd8] sm:$0xff] %vm564_vm2, %v3185_v50 }
 0x1e4   : > { %v3147_v40 = vpop.f32.mrf.mxu0  ;;  %v3187_v43 = vpop.f32.mrf.mxu1  ;;  %3516 = vst [vmem:[%s5201_s18 + $0x140] sm:$0xff] (%p4355_p5), %v3515_v57  ;;  %3518 = vst [vmem:[%s5201_s18 + $0x148] sm:$0xff] (%p4355_p5), %v3517_v17 }
 0x1e6   : > { %v4223_v59 = vpop.f32.mrf.mxu0  ;;  %v4229_v8 = vpop.f32.mrf.mxu1 }
 0x1e8   : > { %v3224_v2 = vpop.f32.mrf.mxu0  ;;  %v3264_v49 = vpop.f32.mrf.mxu1 }
 0x1e9   : > { %v3225_v56 = vadd.f32 %v3224_v2, %v5135_v12  ;;  %v3265_v32 = vadd.f32 %v3264_v49, %v5137_v58 }
 0x1ea   : > { %v4234_v42 = vpop.f32.mrf.mxu0  ;;  %v4240_v52 = vpop.f32.mrf.mxu1  ;;  %v3519_v1 = vld [vmem:[%s5063_s15 + $0xd0] sm:$0xff] (%p4355_p5)  ;;  %v3521_v37 = vld [vmem:[%s5063_s15 + $0xd8] sm:$0xff] (%p4355_p5) }
 0x1eb   : > { %3730 = vst.msk [vmem:[%s5063_s15 + $0xe0] sm:$0xff] %vm564_vm2, %v3225_v56  ;;  %3731 = vst.msk [vmem:[%s5063_s15 + $0xe8] sm:$0xff] %vm564_vm2, %v3265_v32 }
 0x1ec   : > { %v3227_v11 = vpop.f32.mrf.mxu0  ;;  %v3267_v9 = vpop.f32.mrf.mxu1  ;;  %3520 = vst [vmem:[%s5201_s18 + $0x150] sm:$0xff] (%p4355_p5), %v3519_v1  ;;  %3522 = vst [vmem:[%s5201_s18 + $0x158] sm:$0xff] (%p4355_p5), %v3521_v37 }
 0x1ee   : > { %v4235_v7 = vpop.f32.mrf.mxu0  ;;  %v4241_v27 = vpop.f32.mrf.mxu1 }
 0x1f0   : > { %v3304_v10 = vpop.f32.mrf.mxu0  ;;  %v3344_v13 = vpop.f32.mrf.mxu1 }
 0x1f1   : > { %v3305_v60 = vadd.f32 %v3304_v10, %v5139_v36  ;;  %v3345_v12 = vadd.f32 %v3344_v13, %v5141_v25  ;;  %v3467_v36 = vld [vmem:[%s5063_s15] sm:$0xff] (%p4355_p5)  ;;  %v3469_v25 = vld [vmem:[%s5063_s15 + $0x8] sm:$0xff] (%p4355_p5) }
 0x1f2   : > { %v4246_v53 = vpop.f32.mrf.mxu0  ;;  %v4252_v3 = vpop.f32.mrf.mxu1  ;;  %3373 = sbr.rel (!%p4355_p5) target bundleno = 508 (0x1fc), region = 114  ;;  %3468 = vst [vmem:[%s5201_s18] sm:$0xff] (%p4355_p5), %v3467_v36  ;;  %3470 = vst [vmem:[%s5201_s18 + $0x8] sm:$0xff] (%p4355_p5), %v3469_v25  ;;  %v3523_v20 = vld [vmem:[%s5063_s15 + $0xe0] sm:$0xff] (%p4355_p5)  ;;  %v3525_v45 = vld [vmem:[%s5063_s15 + $0xe8] sm:$0xff] (%p4355_p5) }
 0x1f3   : > { %3732 = vst.msk [vmem:[%s5063_s15 + $0xf0] sm:$0xff] %vm564_vm2, %v3305_v60  ;;  %3733 = vst.msk [vmem:[%s5063_s15 + $0xf8] sm:$0xff] %vm564_vm2, %v3345_v12 }
 0x1f4   : > { %v3307_v58 = vpop.f32.mrf.mxu0  ;;  %v3347_v16 = vpop.f32.mrf.mxu1  ;;  %3524 = vst [vmem:[%s5201_s18 + $0x160] sm:$0xff] (%p4355_p5), %v3523_v20  ;;  %3526 = vst [vmem:[%s5201_s18 + $0x168] sm:$0xff] (%p4355_p5), %v3525_v45 }
 0x1f6   : > { %v4247_v19 = vpop.f32.mrf.mxu0  ;;  %v4253_v34 = vpop.f32.mrf.mxu1 }
 0x1fa   : > { %v3527_v14 = vld [vmem:[%s5063_s15 + $0xf0] sm:$0xff]  ;;  %v3529_v15 = vld [vmem:[%s5063_s15 + $0xf8] sm:$0xff] }
 0x1fb   : > { %3528 = vst [vmem:[%s5201_s18 + $0x170] sm:$0xff] %v3527_v14  ;;  %3530 = vst [vmem:[%s5201_s18 + $0x178] sm:$0xff] %v3529_v15 }
 0x1fc PF: > { %p9_p10 = scmp.ge.s32.totalorder %s4338_s13, 4   ;;  %s5282_s9 = smov %s4298_s10 }
 0x1fd   : > { %s5283_s10 = smov %s4349_s16  ;;  %s5284_s11 = smov %s4338_s13 }
 0x1fe   :  { %11 = sbr.rel (!%p9_p10) target bundleno = 2 (0x2), region = 194 }

</bundles_post_ra>
